<compile_context>
chip_gen: v7x
topology: tpu7x:2x2x1
jax: 0.10.0
libtpu: 0.0.40
codegen_flags: <defaults>
</compile_context>

<pallas_src>
import functools
import math

import jax
import jax.numpy as jnp
from jax.experimental import pallas as pl
from jax.experimental.pallas import tpu as pltpu

_VMEM = pltpu.MemorySpace.VMEM
_VMEM_LIMIT = 48 * 1024 * 1024


# ---------------------------------------------------------------------------
# Tiling helpers
# ---------------------------------------------------------------------------
def _pick_tile_m(m, block_m=256):
    """Row tile: divides m, multiple of 8 (or == m), >=2 blocks when possible."""
    if m > block_m:
        t = (block_m // 8) * 8
        while t >= 8:
            if m % t == 0:
                return t
            t -= 8
        return m
    if m >= 16 and m % 16 == 0:
        return m // 2          # two parallel blocks (keeps both v7x TCs busy)
    return m


def _largest_div_tile(n, cap):
    t = (cap // 8) * 8
    while t >= 8:
        if n % t == 0:
            return t
        t -= 8
    return n


# ---------------------------------------------------------------------------
# Kernel 1: fused [RMSNorm prenorm] -> matmul(bf16) -> [+bias] -> [GELU] -> [+residual]
# ---------------------------------------------------------------------------
def _fused_linear_kernel(*refs, has_prenorm, rms_scale, has_bias, activation,
                         has_residual):
    idx = 0
    x = refs[idx][...].astype(jnp.float32); idx += 1
    if has_prenorm:
        gamma = refs[idx][...].astype(jnp.float32); idx += 1
        ssq = jnp.sum(x * x, axis=-1, keepdims=True)
        x = x * (rms_scale * jax.lax.rsqrt(ssq + 1e-24)) * gamma
    w = refs[idx][...]; idx += 1
    out = jnp.dot(x.astype(jnp.bfloat16), w.astype(jnp.bfloat16),
                  preferred_element_type=jnp.float32)
    if has_bias:
        out = out + refs[idx][...].astype(jnp.float32); idx += 1
    if activation == "gelu":
        out = jax.nn.gelu(out, approximate=True)
    if has_residual:
        out = out + refs[idx][...].astype(jnp.float32); idx += 1
    o_ref = refs[idx]
    o_ref[...] = out.astype(o_ref.dtype)      # single full-block lane-dense store


def fused_linear(x, w, *, bias=None, gamma=None, rms_scale=None,
                 activation=None, residual=None, block_m=256):
    """y = [gelu]( [rmsnorm_gamma](x) @ w + bias ) + residual  (all optional)."""
    M, K = x.shape
    Kw, N = w.shape
    assert K == Kw
    tm = _pick_tile_m(M, block_m)
    grid = (M // tm,)

    operands = [x]
    in_specs = [pl.BlockSpec((tm, K), lambda i: (i, 0), memory_space=_VMEM)]
    if gamma is not None:
        assert rms_scale is not None
        operands.append(gamma.reshape(1, K))
        in_specs.append(pl.BlockSpec((1, K), lambda i: (0, 0), memory_space=_VMEM))
    operands.append(w)
    in_specs.append(pl.BlockSpec((K, N), lambda i: (0, 0), memory_space=_VMEM))
    if bias is not None:
        operands.append(bias.reshape(1, N))
        in_specs.append(pl.BlockSpec((1, N), lambda i: (0, 0), memory_space=_VMEM))
    if residual is not None:
        operands.append(residual)
        in_specs.append(pl.BlockSpec((tm, N), lambda i: (i, 0), memory_space=_VMEM))

    kernel = functools.partial(
        _fused_linear_kernel,
        has_prenorm=gamma is not None,
        rms_scale=rms_scale,
        has_bias=bias is not None,
        activation=activation,
        has_residual=residual is not None,
    )
    return pl.pallas_call(
        kernel,
        out_shape=jax.ShapeDtypeStruct((M, N), x.dtype),
        grid=grid,
        in_specs=in_specs,
        out_specs=pl.BlockSpec((tm, N), lambda i: (i, 0), memory_space=_VMEM),
        compiler_params=pltpu.CompilerParams(
            dimension_semantics=("parallel",),
            vmem_limit_bytes=_VMEM_LIMIT),
    )(*operands)


# ---------------------------------------------------------------------------
# Kernel 2: ConvPositionEmbed — depthwise conv1d + bias + GELU + residual
# ---------------------------------------------------------------------------
def _conv_pos_embed_kernel(xp_ref, w_ref, b_ref, o_ref, *, kernel_size, seq_len):
    xp = xp_ref[0].astype(jnp.float32)          # (n + K - 1, dim), padded input
    w = w_ref[...].astype(jnp.float32)          # (K, dim) depthwise taps
    b = b_ref[...].astype(jnp.float32)          # (1, dim)
    dim = xp.shape[-1]
    acc = jnp.zeros((seq_len, dim), jnp.float32)
    for k in range(kernel_size):                # small static unroll (VPU only)
        acc = acc + xp[k:k + seq_len, :] * w[k:k + 1, :]
    acc = acc + b
    pad = kernel_size // 2
    residual = xp[pad:pad + seq_len, :]
    o_ref[0] = (jax.nn.gelu(acc, approximate=True) + residual).astype(o_ref.dtype)


def conv_pos_embed(x, w_conv, b_conv, *, kernel_size):
    b, n, dim = x.shape
    pad = kernel_size // 2
    xp = jnp.pad(x, ((0, 0), (pad, pad), (0, 0)))
    kernel = functools.partial(_conv_pos_embed_kernel,
                               kernel_size=kernel_size, seq_len=n)
    return pl.pallas_call(
        kernel,
        out_shape=jax.ShapeDtypeStruct((b, n, dim), x.dtype),
        grid=(b,),
        in_specs=[
            pl.BlockSpec((1, n + 2 * pad, dim), lambda i: (i, 0, 0),
                         memory_space=_VMEM),
            pl.BlockSpec((kernel_size, dim), lambda i: (0, 0), memory_space=_VMEM),
            pl.BlockSpec((1, dim), lambda i: (0, 0), memory_space=_VMEM),
        ],
        out_specs=pl.BlockSpec((1, n, dim), lambda i: (i, 0, 0), memory_space=_VMEM),
        compiler_params=pltpu.CompilerParams(
            dimension_semantics=("parallel",),
            vmem_limit_bytes=_VMEM_LIMIT),
    )(xp, w_conv, b_conv.reshape(1, dim))


# ---------------------------------------------------------------------------
# Kernel 3: attention — all heads per (batch, q-block); rotary fused, packed layout
# ---------------------------------------------------------------------------
def _attention_kernel(qrow_ref, kv_ref, cosq_ref, sinq_ref, cosk_ref, sink_ref,
                      o_ref, *, scale, heads, dim_head):
    hd = heads * dim_head
    half = dim_head // 2
    q_all = qrow_ref[0].astype(jnp.float32)     # (tq, 3*hd)  (q columns used)
    kv_all = kv_ref[0].astype(jnp.float32)      # (n , 3*hd)  (k/v columns used)
    cos_q = cosq_ref[...]                       # (tq, d)
    sin_q = sinq_ref[...]                       # (tq, d) pre-signed
    cos_k = cosk_ref[...]                       # (n , d)
    sin_k = sink_ref[...]                       # (n , d) pre-signed

    outs = []
    for hi in range(heads):                     # static unroll over heads
        off = hi * dim_head
        qh = q_all[:, off:off + dim_head]
        kh = kv_all[:, hd + off:hd + off + dim_head]
        vh = kv_all[:, 2 * hd + off:2 * hd + off + dim_head]
        # rotary: t*cos + shift_half(t)*sin_signed  (sign folded into sin table)
        qh = qh * cos_q + jnp.concatenate([qh[:, half:], qh[:, :half]], -1) * sin_q
        kh = kh * cos_k + jnp.concatenate([kh[:, half:], kh[:, :half]], -1) * sin_k
        sim = jax.lax.dot_general(
            qh.astype(jnp.bfloat16), kh.astype(jnp.bfloat16),
            (((1,), (1,)), ((), ())), preferred_element_type=jnp.float32) * scale
        sim = sim - jnp.max(sim, axis=-1, keepdims=True)
        p = jnp.exp(sim)
        p = p / jnp.sum(p, axis=-1, keepdims=True)
        outs.append(jnp.dot(p.astype(jnp.bfloat16), vh.astype(jnp.bfloat16),
                            preferred_element_type=jnp.float32))
    o_ref[0] = jnp.concatenate(outs, axis=-1).astype(o_ref.dtype)


def attention(qkv_bnd, cos, sin_signed, *, heads, dim_head, scale, max_tq=256):
    """qkv_bnd: (b, n, 3*h*d) packed qkv straight from the projection kernel."""
    b, n, three_hd = qkv_bnd.shape
    hd = heads * dim_head
    assert three_hd == 3 * hd
    tq = n if n <= max_tq else _largest_div_tile(n, max_tq)
    nq = n // tq

    kernel = functools.partial(_attention_kernel, scale=scale, heads=heads,
                               dim_head=dim_head)
    return pl.pallas_call(
        kernel,
        out_shape=jax.ShapeDtypeStruct((b, n, hd), qkv_bnd.dtype),
        grid=(b, nq),
        in_specs=[
            pl.BlockSpec((1, tq, 3 * hd), lambda bi, qi: (bi, qi, 0),
                         memory_space=_VMEM),
            pl.BlockSpec((1, n, 3 * hd), lambda bi, qi: (bi, 0, 0),
                         memory_space=_VMEM),
            pl.BlockSpec((tq, dim_head), lambda bi, qi: (qi, 0), memory_space=_VMEM),
            pl.BlockSpec((tq, dim_head), lambda bi, qi: (qi, 0), memory_space=_VMEM),
            pl.BlockSpec((n, dim_head), lambda bi, qi: (0, 0), memory_space=_VMEM),
            pl.BlockSpec((n, dim_head), lambda bi, qi: (0, 0), memory_space=_VMEM),
        ],
        out_specs=pl.BlockSpec((1, tq, hd), lambda bi, qi: (bi, qi, 0),
                               memory_space=_VMEM),
        compiler_params=pltpu.CompilerParams(
            dimension_semantics=("parallel", "parallel"),
            vmem_limit_bytes=_VMEM_LIMIT),
    )(qkv_bnd, qkv_bnd, cos, sin_signed, cos, sin_signed)


# ---------------------------------------------------------------------------
# Kernel 4: nn.Embedding — blocked gather (one-hot @ table on the MXU)
# ---------------------------------------------------------------------------
def _embed_onehot_kernel(ids_ref, table_ref, o_ref, *, num_rows):
    ids = ids_ref[...]                                       # (bm, 1) int32
    rows = jax.lax.broadcasted_iota(jnp.int32, (ids.shape[0], num_rows), 1)
    onehot = (ids == rows).astype(jnp.float32)               # (bm, num_rows)
    table = table_ref[...].astype(jnp.float32)               # (num_rows, dim_pe)
    o_ref[...] = jnp.dot(onehot, table,
                         preferred_element_type=jnp.float32).astype(o_ref.dtype)


def embedding_lookup(ids_flat, table, block=256):
    num_rows, dim_pe = table.shape
    m = ids_flat.shape[0]
    bm = _pick_tile_m(m, block)
    ids2 = ids_flat.astype(jnp.int32).reshape(m, 1)
    return pl.pallas_call(
        functools.partial(_embed_onehot_kernel, num_rows=num_rows),
        out_shape=jax.ShapeDtypeStruct((m, dim_pe), table.dtype),
        grid=(m // bm,),
        in_specs=[
            pl.BlockSpec((bm, 1), lambda i: (i, 0), memory_space=_VMEM),
            pl.BlockSpec((num_rows, dim_pe), lambda i: (0, 0), memory_space=_VMEM),
        ],
        out_specs=pl.BlockSpec((bm, dim_pe), lambda i: (i, 0), memory_space=_VMEM),
        compiler_params=pltpu.CompilerParams(
            dimension_semantics=("parallel",),
            vmem_limit_bytes=_VMEM_LIMIT),
    )(ids2, table)


# ---------------------------------------------------------------------------
# Rotary tables (static, tiny — built once outside the kernels)
# ---------------------------------------------------------------------------
def rotary_tables(seq_len, dim_head, theta=10000.0):
    inv_freq = 1.0 / (theta ** (jnp.arange(0, dim_head, 2, dtype=jnp.float32)
                                / dim_head))
    t = jnp.arange(seq_len, dtype=jnp.float32)
    freqs = jnp.einsum("i,j->ij", t, inv_freq)
    freqs = jnp.concatenate([freqs, freqs], axis=-1)         # (n, dim_head)
    return jnp.cos(freqs), jnp.sin(freqs)


# ---------------------------------------------------------------------------
# DurationPredictor forward (Pallas path)
# ---------------------------------------------------------------------------
def duration_predictor_forward(params, x, phoneme_ids, cond, *, heads, dim_head,
                               conv_kernel_size):
    b, n, dim = x.shape
    rms_scale = math.sqrt(dim)
    attn_scale = dim_head ** -0.5
    hd = heads * dim_head

    # phoneme embedding (blocked Pallas gather)
    pe = embedding_lookup(phoneme_ids.reshape(-1), params["phoneme_emb"])
    pe = pe.reshape(b, n, -1)

    # to_embed: cat(x, phoneme_emb, cond) -> Linear
    embed = jnp.concatenate([x, pe, cond], axis=-1).reshape(b * n, -1)
    h = fused_linear(embed, params["w_embed"], bias=params["b_embed"])

    # conv positional embedding + residual
    h = conv_pos_embed(h.reshape(b, n, dim), params["w_conv"], params["b_conv"],
                       kernel_size=conv_kernel_size)
    h = h.reshape(b * n, dim)

    cos, sin = rotary_tables(n, dim_head)
    half = dim_head // 2
    sign = jnp.concatenate([-jnp.ones((half,), jnp.float32),
                            jnp.ones((half,), jnp.float32)])
    sin_signed = sin * sign          # fold the rotate_half negation into the table

    skips = []
    for layer in params["layers"]:
        if layer["w_skip"] is None:
            skips.append(h)
        else:
            h = fused_linear(jnp.concatenate([h, skips.pop()], axis=-1),
                             layer["w_skip"], bias=layer["b_skip"])

        # ---- attention block (RMSNorm prenorm fused into qkv projection) ----
        qkv = fused_linear(h, layer["w_qkv"], gamma=layer["g_attn"],
                           rms_scale=rms_scale)
        attn_out = attention(qkv.reshape(b, n, 3 * hd), cos, sin_signed,
                             heads=heads, dim_head=dim_head, scale=attn_scale)
        h = fused_linear(attn_out.reshape(b * n, hd), layer["w_attn_out"],
                         residual=h)

        # ---- feedforward block (prenorm + FF1 + GELU fused; FF2 + residual) ----
        ff = fused_linear(h, layer["w_ff1"], bias=layer["b_ff1"],
                          gamma=layer["g_ff"], rms_scale=rms_scale,
                          activation="gelu")
        h = fused_linear(ff, layer["w_ff2"], bias=layer["b_ff2"], residual=h)

    # final RMSNorm fused into to_pred; weight padded to N=128 for lane-dense stores
    w_pred_pad = jnp.pad(params["w_pred"], ((0, 0), (0, 128 - params["w_pred"].shape[1])))
    b_pred_pad = jnp.pad(params["b_pred"], (0, 128 - params["b_pred"].shape[0]))
    pred = fused_linear(h, w_pred_pad, bias=b_pred_pad,
                        gamma=params["g_final"], rms_scale=rms_scale)
    return pred[:, 0].reshape(b, n)


# ---------------------------------------------------------------------------
# Pure-JAX reference (mirrors the PyTorch forward, f32 throughout)
# ---------------------------------------------------------------------------
def _rmsnorm_ref(x, gamma, scale):
    norm = jnp.sqrt(jnp.sum(x * x, axis=-1, keepdims=True))
    return x * (scale / jnp.maximum(norm, 1e-12)) * gamma


def _rotate_half_ref(t):
    t1, t2 = jnp.split(t, 2, axis=-1)
    return jnp.concatenate([-t2, t1], axis=-1)


def duration_predictor_ref(params, x, phoneme_ids, cond, *, heads, dim_head,
                           conv_kernel_size):
    b, n, dim = x.shape
    rms_scale = math.sqrt(dim)
    attn_scale = dim_head ** -0.5
    hd = heads * dim_head

    pe = jnp.take(params["phoneme_emb"], phoneme_ids.reshape(-1), axis=0)
    pe = pe.reshape(b, n, -1)
    embed = jnp.concatenate([x, pe, cond], axis=-1)
    h = embed @ params["w_embed"] + params["b_embed"]

    pad = conv_kernel_size // 2
    xp = jnp.pad(h, ((0, 0), (pad, pad), (0, 0)))
    acc = jnp.zeros_like(h)
    for k in range(conv_kernel_size):
        acc = acc + xp[:, k:k + n, :] * params["w_conv"][k]
    acc = acc + params["b_conv"]
    h = jax.nn.gelu(acc, approximate=True) + h

    cos, sin = rotary_tables(n, dim_head)

    skips = []
    for layer in params["layers"]:
        if layer["w_skip"] is None:
            skips.append(h)
        else:
            h = (jnp.concatenate([h, skips.pop()], axis=-1) @ layer["w_skip"]
                 + layer["b_skip"])

        normed = _rmsnorm_ref(h, layer["g_attn"], rms_scale)
        qkv = normed @ layer["w_qkv"]
        q, k, v = qkv[..., :hd], qkv[..., hd:2 * hd], qkv[..., 2 * hd:]

        def split_heads(t):
            return t.reshape(b, n, heads, dim_head).transpose(0, 2, 1, 3)

        q, k, v = map(split_heads, (q, k, v))
        q = q * cos + _rotate_half_ref(q) * sin
        k = k * cos + _rotate_half_ref(k) * sin
        sim = jnp.einsum("bhid,bhjd->bhij", q, k) * attn_scale
        sim = sim - jnp.max(sim, axis=-1, keepdims=True)
        p = jnp.exp(sim)
        p = p / jnp.sum(p, axis=-1, keepdims=True)
        out = jnp.einsum("bhij,bhjd->bhid", p, v)
        out = out.transpose(0, 2, 1, 3).reshape(b, n, hd)
        h = out @ layer["w_attn_out"] + h

        normed = _rmsnorm_ref(h, layer["g_ff"], rms_scale)
        ff = jax.nn.gelu(normed @ layer["w_ff1"] + layer["b_ff1"],
                         approximate=True)
        h = ff @ layer["w_ff2"] + layer["b_ff2"] + h

    normed = _rmsnorm_ref(h, params["g_final"], rms_scale)
    pred = normed @ params["w_pred"] + params["b_pred"]
    return pred[..., 0]


# ---------------------------------------------------------------------------
# Parameter init (deterministic, torch-layer-equivalent shapes in (in, out) form)
# ---------------------------------------------------------------------------
def init_params(key, *, num_phoneme_tokens, dim, dim_phoneme_emb, depth, heads,
                dim_head, ff_mult, conv_kernel_size):
    keys = jax.random.split(key, 64)
    ki = iter(keys)

    def dense(shape):
        fan_in = shape[0]
        return jax.random.normal(next(ki), shape, jnp.float32) / math.sqrt(fan_in)

    dim_inner = heads * dim_head
    params = {
        "phoneme_emb": jax.random.normal(
            next(ki), (num_phoneme_tokens + 1, dim_phoneme_emb),
            jnp.float32) * 0.02,
        "w_embed": dense((dim * 2 + dim_phoneme_emb, dim)),
        "b_embed": jnp.zeros((dim,), jnp.float32),
        "w_conv": dense((conv_kernel_size, dim)),     # depthwise taps (K, dim)
        "b_conv": jnp.zeros((dim,), jnp.float32),
        "g_final": jnp.ones((dim,), jnp.float32),
        "w_pred": dense((dim, 1)),
        "b_pred": jnp.zeros((1,), jnp.float32),
        "layers": [],
    }
    for ind in range(depth):
        has_skip = (ind + 1) > depth // 2
        params["layers"].append({
            "w_skip": dense((dim * 2, dim)) if has_skip else None,
            "b_skip": jnp.zeros((dim,), jnp.float32) if has_skip else None,
            "g_attn": jnp.ones((dim,), jnp.float32),
            "w_qkv": dense((dim, dim_inner * 3)),
            "w_attn_out": dense((dim_inner, dim)),
            "g_ff": jnp.ones((dim,), jnp.float32),
            "w_ff1": dense((dim, dim * ff_mult)),
            "b_ff1": jnp.zeros((dim * ff_mult,), jnp.float32),
            "w_ff2": dense((dim * ff_mult, dim)),
            "b_ff2": jnp.zeros((dim,), jnp.float32),
        })
    return params


if __name__ == "__main__":
    # Small DurationPredictor config (inference logits path)
    batch, seq_len = 2, 8
    dim = 64
    dim_phoneme_emb = 64
    num_phoneme_tokens = 10
    depth = 2
    heads = 4
    dim_head = 16
    ff_mult = 4
    conv_kernel_size = 7

    key = jax.random.PRNGKey(0)
    k_params, k_x, k_cond, k_ids = jax.random.split(key, 4)
    params = init_params(k_params, num_phoneme_tokens=num_phoneme_tokens,
                         dim=dim, dim_phoneme_emb=dim_phoneme_emb, depth=depth,
                         heads=heads, dim_head=dim_head, ff_mult=ff_mult,
                         conv_kernel_size=conv_kernel_size)

    x = jax.random.normal(k_x, (batch, seq_len, dim), jnp.float32)
    cond = jax.random.normal(k_cond, (batch, seq_len, dim), jnp.float32)
    phoneme_ids = jax.random.randint(k_ids, (batch, seq_len), 0,
                                     num_phoneme_tokens)

    fwd = functools.partial(duration_predictor_forward, heads=heads,
                            dim_head=dim_head,
                            conv_kernel_size=conv_kernel_size)
    out = jax.jit(fwd)(params, x, phoneme_ids, cond)
    out = jax.block_until_ready(out)

    ref = duration_predictor_ref(params, x, phoneme_ids, cond, heads=heads,
                                 dim_head=dim_head,
                                 conv_kernel_size=conv_kernel_size)
    assert out.shape == (batch, seq_len), out.shape
    max_err = float(jnp.max(jnp.abs(out - ref)))
    # Tolerance accommodates bf16 MXU operands (f32 accumulation) vs the f32 reference.
    assert jnp.allclose(out, ref, atol=2e-2, rtol=2e-2), max_err

    print("KERNEL_OK")
</pallas_src>

<mosaic_0001>
module attributes {stable_mosaic.version = 11 : i64} {
  func.func @_embed_onehot_kernel(%arg0: i32, %arg1: memref<8x1xi32, #tpu.memory_space<vmem>>, %arg2: memref<11x64xf32, #tpu.memory_space<vmem>>, %arg3: memref<8x64xf32, #tpu.memory_space<vmem>>) attributes {dimension_semantics = [#tpu.dimension_semantics<parallel>], iteration_bounds = array<i64: 2>, scalar_prefetch = 0 : i64, scratch_operands = 0 : i64, tpu.core_type = #tpu.core_type<tc>, window_params = [{transform_indices = @transform_0, window_bounds = array<i64: 8, 1>}, {pipeline_mode = #tpu.pipeline_mode<synchronous>, transform_indices = @transform_1, window_bounds = array<i64: 11, 64>}, {transform_indices = @transform_2, window_bounds = array<i64: 8, 64>}]} {
    %c0 = arith.constant 0 : index
    %c0_0 = arith.constant 0 : index
    %0 = vector.load %arg1[%c0, %c0_0] : memref<8x1xi32, #tpu.memory_space<vmem>>, vector<8x1xi32>
    %1 = tpu.iota {dimensions = array<i32: 1>} : vector<8x11xi32>
    %2 = vector.broadcast %0 : vector<8x1xi32> to vector<8x11xi32>
    %3 = arith.cmpi eq, %2, %1 : vector<8x11xi32>
    %4 = arith.extui %3 : vector<8x11xi1> to vector<8x11xi32>
    %5 = arith.sitofp %4 : vector<8x11xi32> to vector<8x11xf32>
    %c0_1 = arith.constant 0 : index
    %c0_2 = arith.constant 0 : index
    %6 = vector.load %arg2[%c0_1, %c0_2] : memref<11x64xf32, #tpu.memory_space<vmem>>, vector<11x64xf32>
    %cst = arith.constant dense<0.000000e+00> : vector<8x64xf32>
    %7 = tpu.matmul %5, %6, %cst {dimension_numbers = #tpu.dot_dimension_numbers<[1], [0], [0], [1], [0, 0, 1, 1], [], []>} : vector<8x11xf32>, vector<11x64xf32>, vector<8x64xf32> -> vector<8x64xf32>
    %c0_3 = arith.constant 0 : index
    %c0_4 = arith.constant 0 : index
    %8 = vector.load %arg3[%c0_3, %c0_4] : memref<8x64xf32, #tpu.memory_space<vmem>>, vector<8x64xf32>
    tpu.vector_store %arg3[%c0_3, %c0_4], %7 {strides = array<i32>} : memref<8x64xf32, #tpu.memory_space<vmem>>, vector<8x64xf32>,
    return
  }
  func.func @transform_0(%arg0: i32) -> (i32, i32) {
    %c0_i32 = arith.constant 0 : i32
    %c0_i32_0 = arith.constant 0 : i32
    return %arg0, %c0_i32 : i32, i32
  }
  func.func @transform_1(%arg0: i32) -> (i32, i32) {
    %c0_i32 = arith.constant 0 : i32
    %c0_i32_0 = arith.constant 0 : i32
    %c0_i32_1 = arith.constant 0 : i32
    return %c0_i32, %c0_i32_0 : i32, i32
  }
  func.func @transform_2(%arg0: i32) -> (i32, i32) {
    %c0_i32 = arith.constant 0 : i32
    %c0_i32_0 = arith.constant 0 : i32
    return %arg0, %c0_i32 : i32, i32
  }
}

module attributes {stable_mosaic.version = 11 : i64} {
  func.func @_conv_pos_embed_kernel(%arg0: i32, %arg1: memref<1x14x64xf32, #tpu.memory_space<vmem>>, %arg2: memref<7x64xf32, #tpu.memory_space<vmem>>, %arg3: memref<1x64xf32, #tpu.memory_space<vmem>>, %arg4: memref<1x8x64xf32, #tpu.memory_space<vmem>>) attributes {dimension_semantics = [#tpu.dimension_semantics<parallel>], iteration_bounds = array<i64: 2>, scalar_prefetch = 0 : i64, scratch_operands = 0 : i64, tpu.core_type = #tpu.core_type<tc>, window_params = [{transform_indices = @transform_0, window_bounds = array<i64: 1, 14, 64>}, {pipeline_mode = #tpu.pipeline_mode<synchronous>, transform_indices = @transform_1, window_bounds = array<i64: 7, 64>}, {pipeline_mode = #tpu.pipeline_mode<synchronous>, transform_indices = @transform_2, window_bounds = array<i64: 1, 64>}, {transform_indices = @transform_3, window_bounds = array<i64: 1, 8, 64>}]} {
    %c0 = arith.constant 0 : index
    %c0_0 = arith.constant 0 : index
    %c0_1 = arith.constant 0 : index
    %0 = vector.load %arg1[%c0, %c0_0, %c0_1] : memref<1x14x64xf32, #tpu.memory_space<vmem>>, vector<1x14x64xf32>
    %1 = vector.shape_cast %0 : vector<1x14x64xf32> to vector<14x64xf32>
    %c0_2 = arith.constant 0 : index
    %c0_3 = arith.constant 0 : index
    %2 = vector.load %arg2[%c0_2, %c0_3] : memref<7x64xf32, #tpu.memory_space<vmem>>, vector<7x64xf32>
    %c0_4 = arith.constant 0 : index
    %c0_5 = arith.constant 0 : index
    %3 = vector.load %arg3[%c0_4, %c0_5] : memref<1x64xf32, #tpu.memory_space<vmem>>, vector<1x64xf32>
    %cst = arith.constant 0.000000e+00 : f32
    %4 = vector.broadcast %cst : f32 to vector<8x64xf32>
    %5 = vector.extract_strided_slice %1 {offsets = [0, 0], sizes = [8, 64], strides = [1, 1]} : vector<14x64xf32> to vector<8x64xf32>
    %6 = vector.extract_strided_slice %2 {offsets = [0, 0], sizes = [1, 64], strides = [1, 1]} : vector<7x64xf32> to vector<1x64xf32>
    %7 = vector.broadcast %6 : vector<1x64xf32> to vector<8x64xf32>
    %8 = arith.mulf %5, %7 : vector<8x64xf32>
    %9 = arith.addf %4, %8 : vector<8x64xf32>
    %10 = vector.extract_strided_slice %1 {offsets = [1, 0], sizes = [8, 64], strides = [1, 1]} : vector<14x64xf32> to vector<8x64xf32>
    %11 = vector.extract_strided_slice %2 {offsets = [1, 0], sizes = [1, 64], strides = [1, 1]} : vector<7x64xf32> to vector<1x64xf32>
    %12 = vector.broadcast %11 : vector<1x64xf32> to vector<8x64xf32>
    %13 = arith.mulf %10, %12 : vector<8x64xf32>
    %14 = arith.addf %9, %13 : vector<8x64xf32>
    %15 = vector.extract_strided_slice %1 {offsets = [2, 0], sizes = [8, 64], strides = [1, 1]} : vector<14x64xf32> to vector<8x64xf32>
    %16 = vector.extract_strided_slice %2 {offsets = [2, 0], sizes = [1, 64], strides = [1, 1]} : vector<7x64xf32> to vector<1x64xf32>
    %17 = vector.broadcast %16 : vector<1x64xf32> to vector<8x64xf32>
    %18 = arith.mulf %15, %17 : vector<8x64xf32>
    %19 = arith.addf %14, %18 : vector<8x64xf32>
    %20 = vector.extract_strided_slice %1 {offsets = [3, 0], sizes = [8, 64], strides = [1, 1]} : vector<14x64xf32> to vector<8x64xf32>
    %21 = vector.extract_strided_slice %2 {offsets = [3, 0], sizes = [1, 64], strides = [1, 1]} : vector<7x64xf32> to vector<1x64xf32>
    %22 = vector.broadcast %21 : vector<1x64xf32> to vector<8x64xf32>
    %23 = arith.mulf %20, %22 : vector<8x64xf32>
    %24 = arith.addf %19, %23 : vector<8x64xf32>
    %25 = vector.extract_strided_slice %1 {offsets = [4, 0], sizes = [8, 64], strides = [1, 1]} : vector<14x64xf32> to vector<8x64xf32>
    %26 = vector.extract_strided_slice %2 {offsets = [4, 0], sizes = [1, 64], strides = [1, 1]} : vector<7x64xf32> to vector<1x64xf32>
    %27 = vector.broadcast %26 : vector<1x64xf32> to vector<8x64xf32>
    %28 = arith.mulf %25, %27 : vector<8x64xf32>
    %29 = arith.addf %24, %28 : vector<8x64xf32>
    %30 = vector.extract_strided_slice %1 {offsets = [5, 0], sizes = [8, 64], strides = [1, 1]} : vector<14x64xf32> to vector<8x64xf32>
    %31 = vector.extract_strided_slice %2 {offsets = [5, 0], sizes = [1, 64], strides = [1, 1]} : vector<7x64xf32> to vector<1x64xf32>
    %32 = vector.broadcast %31 : vector<1x64xf32> to vector<8x64xf32>
    %33 = arith.mulf %30, %32 : vector<8x64xf32>
    %34 = arith.addf %29, %33 : vector<8x64xf32>
    %35 = vector.extract_strided_slice %1 {offsets = [6, 0], sizes = [8, 64], strides = [1, 1]} : vector<14x64xf32> to vector<8x64xf32>
    %36 = vector.extract_strided_slice %2 {offsets = [6, 0], sizes = [1, 64], strides = [1, 1]} : vector<7x64xf32> to vector<1x64xf32>
    %37 = vector.broadcast %36 : vector<1x64xf32> to vector<8x64xf32>
    %38 = arith.mulf %35, %37 : vector<8x64xf32>
    %39 = arith.addf %34, %38 : vector<8x64xf32>
    %40 = vector.broadcast %3 : vector<1x64xf32> to vector<8x64xf32>
    %41 = arith.addf %39, %40 : vector<8x64xf32>
    %42 = vector.extract_strided_slice %1 {offsets = [3, 0], sizes = [8, 64], strides = [1, 1]} : vector<14x64xf32> to vector<8x64xf32>
    %43 = arith.mulf %41, %41 : vector<8x64xf32>
    %44 = arith.mulf %41, %43 : vector<8x64xf32>
    %cst_6 = arith.constant 4.471500e-02 : f32
    %45 = vector.broadcast %cst_6 : f32 to vector<8x64xf32>
    %46 = arith.mulf %45, %44 : vector<8x64xf32>
    %47 = arith.addf %41, %46 : vector<8x64xf32>
    %cst_7 = arith.constant 0.797884583 : f32
    %48 = vector.broadcast %cst_7 : f32 to vector<8x64xf32>
    %49 = arith.mulf %48, %47 : vector<8x64xf32>
    %50 = math.tanh %49 : vector<8x64xf32>
    %cst_8 = arith.constant 1.000000e+00 : f32
    %51 = vector.broadcast %cst_8 : f32 to vector<8x64xf32>
    %52 = arith.addf %51, %50 : vector<8x64xf32>
    %cst_9 = arith.constant 5.000000e-01 : f32
    %53 = vector.broadcast %cst_9 : f32 to vector<8x64xf32>
    %54 = arith.mulf %53, %52 : vector<8x64xf32>
    %55 = arith.mulf %41, %54 : vector<8x64xf32>
    %56 = arith.addf %55, %42 : vector<8x64xf32>
    %c0_10 = arith.constant 0 : index
    %c0_11 = arith.constant 0 : index
    %c0_12 = arith.constant 0 : index
    %57 = vector.load %arg4[%c0_10, %c0_11, %c0_12] : memref<1x8x64xf32, #tpu.memory_space<vmem>>, vector<1x8x64xf32>
    %58 = vector.shape_cast %57 : vector<1x8x64xf32> to vector<8x64xf32>
    %59 = vector.shape_cast %56 : vector<8x64xf32> to vector<1x8x64xf32>
    tpu.vector_store %arg4[%c0_10, %c0_11, %c0_12], %59 {strides = array<i32>} : memref<1x8x64xf32, #tpu.memory_space<vmem>>, vector<1x8x64xf32>,
    return
  }
  func.func @transform_0(%arg0: i32) -> (i32, i32, i32) {
    %c0_i32 = arith.constant 0 : i32
    %c0_i32_0 = arith.constant 0 : i32
    %c0_i32_1 = arith.constant 0 : i32
    return %arg0, %c0_i32, %c0_i32_0 : i32, i32, i32
  }
  func.func @transform_1(%arg0: i32) -> (i32, i32) {
    %c0_i32 = arith.constant 0 : i32
    %c0_i32_0 = arith.constant 0 : i32
    %c0_i32_1 = arith.constant 0 : i32
    return %c0_i32, %c0_i32_0 : i32, i32
  }
  func.func @transform_2(%arg0: i32) -> (i32, i32) {
    %c0_i32 = arith.constant 0 : i32
    %c0_i32_0 = arith.constant 0 : i32
    %c0_i32_1 = arith.constant 0 : i32
    return %c0_i32, %c0_i32_0 : i32, i32
  }
  func.func @transform_3(%arg0: i32) -> (i32, i32, i32) {
    %c0_i32 = arith.constant 0 : i32
    %c0_i32_0 = arith.constant 0 : i32
    %c0_i32_1 = arith.constant 0 : i32
    return %arg0, %c0_i32, %c0_i32_0 : i32, i32, i32
  }
}

module attributes {stable_mosaic.version = 11 : i64} {
  func.func @_fused_linear_kernel(%arg0: i32, %arg1: memref<8x64xf32, #tpu.memory_space<vmem>>, %arg2: memref<1x64xf32, #tpu.memory_space<vmem>>, %arg3: memref<64x192xf32, #tpu.memory_space<vmem>>, %arg4: memref<8x192xf32, #tpu.memory_space<vmem>>) attributes {dimension_semantics = [#tpu.dimension_semantics<parallel>], iteration_bounds = array<i64: 2>, scalar_prefetch = 0 : i64, scratch_operands = 0 : i64, tpu.core_type = #tpu.core_type<tc>, window_params = [{transform_indices = @transform_0, window_bounds = array<i64: 8, 64>}, {pipeline_mode = #tpu.pipeline_mode<synchronous>, transform_indices = @transform_1, window_bounds = array<i64: 1, 64>}, {pipeline_mode = #tpu.pipeline_mode<synchronous>, transform_indices = @transform_2, window_bounds = array<i64: 64, 192>}, {transform_indices = @transform_3, window_bounds = array<i64: 8, 192>}]} {
    %c0 = arith.constant 0 : index
    %c0_0 = arith.constant 0 : index
    %0 = vector.load %arg1[%c0, %c0_0] : memref<8x64xf32, #tpu.memory_space<vmem>>, vector<8x64xf32>
    %c0_1 = arith.constant 0 : index
    %c0_2 = arith.constant 0 : index
    %1 = vector.load %arg2[%c0_1, %c0_2] : memref<1x64xf32, #tpu.memory_space<vmem>>, vector<1x64xf32>
    %2 = arith.mulf %0, %0 : vector<8x64xf32>
    %cst = arith.constant dense<0.000000e+00> : vector<8xf32>
    %3 = vector.multi_reduction <add>, %2, %cst [1] : vector<8x64xf32> to vector<8xf32>
    %4 = vector.shape_cast %3 : vector<8xf32> to vector<8x1xf32>
    %cst_3 = arith.constant 1.000000e-24 : f32
    %5 = vector.broadcast %cst_3 : f32 to vector<8x1xf32>
    %6 = arith.addf %4, %5 : vector<8x1xf32>
    %7 = math.rsqrt %6 : vector<8x1xf32>
    %cst_4 = arith.constant 8.000000e+00 : f32
    %8 = vector.broadcast %cst_4 : f32 to vector<8x1xf32>
    %9 = arith.mulf %8, %7 : vector<8x1xf32>
    %10 = vector.broadcast %9 : vector<8x1xf32> to vector<8x64xf32>
    %11 = arith.mulf %0, %10 : vector<8x64xf32>
    %12 = vector.broadcast %1 : vector<1x64xf32> to vector<8x64xf32>
    %13 = arith.mulf %11, %12 : vector<8x64xf32>
    %c0_5 = arith.constant 0 : index
    %c0_6 = arith.constant 0 : index
    %14 = vector.load %arg3[%c0_5, %c0_6] : memref<64x192xf32, #tpu.memory_space<vmem>>, vector<64x192xf32>
    %15 = arith.truncf %13 : vector<8x64xf32> to vector<8x64xbf16>
    %16 = arith.truncf %14 : vector<64x192xf32> to vector<64x192xbf16>
    %cst_7 = arith.constant dense<0.000000e+00> : vector<8x192xf32>
    %17 = tpu.matmul %15, %16, %cst_7 {dimension_numbers = #tpu.dot_dimension_numbers<[1], [0], [0], [1], [0, 0, 1, 1], [], []>} : vector<8x64xbf16>, vector<64x192xbf16>, vector<8x192xf32> -> vector<8x192xf32>
    %c0_8 = arith.constant 0 : index
    %c0_9 = arith.constant 0 : index
    %18 = vector.load %arg4[%c0_8, %c0_9] : memref<8x192xf32, #tpu.memory_space<vmem>>, vector<8x192xf32>
    tpu.vector_store %arg4[%c0_8, %c0_9], %17 {strides = array<i32>} : memref<8x192xf32, #tpu.memory_space<vmem>>, vector<8x192xf32>,
    return
  }
  func.func @transform_0(%arg0: i32) -> (i32, i32) {
    %c0_i32 = arith.constant 0 : i32
    %c0_i32_0 = arith.constant 0 : i32
    return %arg0, %c0_i32 : i32, i32
  }
  func.func @transform_1(%arg0: i32) -> (i32, i32) {
    %c0_i32 = arith.constant 0 : i32
    %c0_i32_0 = arith.constant 0 : i32
    %c0_i32_1 = arith.constant 0 : i32
    return %c0_i32, %c0_i32_0 : i32, i32
  }
  func.func @transform_2(%arg0: i32) -> (i32, i32) {
    %c0_i32 = arith.constant 0 : i32
    %c0_i32_0 = arith.constant 0 : i32
    %c0_i32_1 = arith.constant 0 : i32
    return %c0_i32, %c0_i32_0 : i32, i32
  }
  func.func @transform_3(%arg0: i32) -> (i32, i32) {
    %c0_i32 = arith.constant 0 : i32
    %c0_i32_0 = arith.constant 0 : i32
    return %arg0, %c0_i32 : i32, i32
  }
}

module attributes {stable_mosaic.version = 11 : i64} {
  func.func @_fused_linear_kernel(%arg0: i32, %arg1: memref<8x192xf32, #tpu.memory_space<vmem>>, %arg2: memref<192x64xf32, #tpu.memory_space<vmem>>, %arg3: memref<1x64xf32, #tpu.memory_space<vmem>>, %arg4: memref<8x64xf32, #tpu.memory_space<vmem>>) attributes {dimension_semantics = [#tpu.dimension_semantics<parallel>], iteration_bounds = array<i64: 2>, scalar_prefetch = 0 : i64, scratch_operands = 0 : i64, tpu.core_type = #tpu.core_type<tc>, window_params = [{transform_indices = @transform_0, window_bounds = array<i64: 8, 192>}, {pipeline_mode = #tpu.pipeline_mode<synchronous>, transform_indices = @transform_1, window_bounds = array<i64: 192, 64>}, {pipeline_mode = #tpu.pipeline_mode<synchronous>, transform_indices = @transform_2, window_bounds = array<i64: 1, 64>}, {transform_indices = @transform_3, window_bounds = array<i64: 8, 64>}]} {
    %c0 = arith.constant 0 : index
    %c0_0 = arith.constant 0 : index
    %0 = vector.load %arg1[%c0, %c0_0] : memref<8x192xf32, #tpu.memory_space<vmem>>, vector<8x192xf32>
    %c0_1 = arith.constant 0 : index
    %c0_2 = arith.constant 0 : index
    %1 = vector.load %arg2[%c0_1, %c0_2] : memref<192x64xf32, #tpu.memory_space<vmem>>, vector<192x64xf32>
    %2 = arith.truncf %0 : vector<8x192xf32> to vector<8x192xbf16>
    %3 = arith.truncf %1 : vector<192x64xf32> to vector<192x64xbf16>
    %cst = arith.constant dense<0.000000e+00> : vector<8x64xf32>
    %4 = tpu.matmul %2, %3, %cst {dimension_numbers = #tpu.dot_dimension_numbers<[1], [0], [0], [1], [0, 0, 1, 1], [], []>} : vector<8x192xbf16>, vector<192x64xbf16>, vector<8x64xf32> -> vector<8x64xf32>
    %c0_3 = arith.constant 0 : index
    %c0_4 = arith.constant 0 : index
    %5 = vector.load %arg3[%c0_3, %c0_4] : memref<1x64xf32, #tpu.memory_space<vmem>>, vector<1x64xf32>
    %6 = vector.broadcast %5 : vector<1x64xf32> to vector<8x64xf32>
    %7 = arith.addf %4, %6 : vector<8x64xf32>
    %c0_5 = arith.constant 0 : index
    %c0_6 = arith.constant 0 : index
    %8 = vector.load %arg4[%c0_5, %c0_6] : memref<8x64xf32, #tpu.memory_space<vmem>>, vector<8x64xf32>
    tpu.vector_store %arg4[%c0_5, %c0_6], %7 {strides = array<i32>} : memref<8x64xf32, #tpu.memory_space<vmem>>, vector<8x64xf32>,
    return
  }
  func.func @transform_0(%arg0: i32) -> (i32, i32) {
    %c0_i32 = arith.constant 0 : i32
    %c0_i32_0 = arith.constant 0 : i32
    return %arg0, %c0_i32 : i32, i32
  }
  func.func @transform_1(%arg0: i32) -> (i32, i32) {
    %c0_i32 = arith.constant 0 : i32
    %c0_i32_0 = arith.constant 0 : i32
    %c0_i32_1 = arith.constant 0 : i32
    return %c0_i32, %c0_i32_0 : i32, i32
  }
  func.func @transform_2(%arg0: i32) -> (i32, i32) {
    %c0_i32 = arith.constant 0 : i32
    %c0_i32_0 = arith.constant 0 : i32
    %c0_i32_1 = arith.constant 0 : i32
    return %c0_i32, %c0_i32_0 : i32, i32
  }
  func.func @transform_3(%arg0: i32) -> (i32, i32) {
    %c0_i32 = arith.constant 0 : i32
    %c0_i32_0 = arith.constant 0 : i32
    return %arg0, %c0_i32 : i32, i32
  }
}

module attributes {stable_mosaic.version = 11 : i64} {
  func.func @_fused_linear_kernel(%arg0: i32, %arg1: memref<8x64xf32, #tpu.memory_space<vmem>>, %arg2: memref<64x64xf32, #tpu.memory_space<vmem>>, %arg3: memref<8x64xf32, #tpu.memory_space<vmem>>, %arg4: memref<8x64xf32, #tpu.memory_space<vmem>>) attributes {dimension_semantics = [#tpu.dimension_semantics<parallel>], iteration_bounds = array<i64: 2>, scalar_prefetch = 0 : i64, scratch_operands = 0 : i64, tpu.core_type = #tpu.core_type<tc>, window_params = [{transform_indices = @transform_0, window_bounds = array<i64: 8, 64>}, {pipeline_mode = #tpu.pipeline_mode<synchronous>, transform_indices = @transform_1, window_bounds = array<i64: 64, 64>}, {transform_indices = @transform_2, window_bounds = array<i64: 8, 64>}, {transform_indices = @transform_3, window_bounds = array<i64: 8, 64>}]} {
    %c0 = arith.constant 0 : index
    %c0_0 = arith.constant 0 : index
    %0 = vector.load %arg1[%c0, %c0_0] : memref<8x64xf32, #tpu.memory_space<vmem>>, vector<8x64xf32>
    %c0_1 = arith.constant 0 : index
    %c0_2 = arith.constant 0 : index
    %1 = vector.load %arg2[%c0_1, %c0_2] : memref<64x64xf32, #tpu.memory_space<vmem>>, vector<64x64xf32>
    %2 = arith.truncf %0 : vector<8x64xf32> to vector<8x64xbf16>
    %3 = arith.truncf %1 : vector<64x64xf32> to vector<64x64xbf16>
    %cst = arith.constant dense<0.000000e+00> : vector<8x64xf32>
    %4 = tpu.matmul %2, %3, %cst {dimension_numbers = #tpu.dot_dimension_numbers<[1], [0], [0], [1], [0, 0, 1, 1], [], []>} : vector<8x64xbf16>, vector<64x64xbf16>, vector<8x64xf32> -> vector<8x64xf32>
    %c0_3 = arith.constant 0 : index
    %c0_4 = arith.constant 0 : index
    %5 = vector.load %arg3[%c0_3, %c0_4] : memref<8x64xf32, #tpu.memory_space<vmem>>, vector<8x64xf32>
    %6 = arith.addf %4, %5 : vector<8x64xf32>
    %c0_5 = arith.constant 0 : index
    %c0_6 = arith.constant 0 : index
    %7 = vector.load %arg4[%c0_5, %c0_6] : memref<8x64xf32, #tpu.memory_space<vmem>>, vector<8x64xf32>
    tpu.vector_store %arg4[%c0_5, %c0_6], %6 {strides = array<i32>} : memref<8x64xf32, #tpu.memory_space<vmem>>, vector<8x64xf32>,
    return
  }
  func.func @transform_0(%arg0: i32) -> (i32, i32) {
    %c0_i32 = arith.constant 0 : i32
    %c0_i32_0 = arith.constant 0 : i32
    return %arg0, %c0_i32 : i32, i32
  }
  func.func @transform_1(%arg0: i32) -> (i32, i32) {
    %c0_i32 = arith.constant 0 : i32
    %c0_i32_0 = arith.constant 0 : i32
    %c0_i32_1 = arith.constant 0 : i32
    return %c0_i32, %c0_i32_0 : i32, i32
  }
  func.func @transform_2(%arg0: i32) -> (i32, i32) {
    %c0_i32 = arith.constant 0 : i32
    %c0_i32_0 = arith.constant 0 : i32
    return %arg0, %c0_i32 : i32, i32
  }
  func.func @transform_3(%arg0: i32) -> (i32, i32) {
    %c0_i32 = arith.constant 0 : i32
    %c0_i32_0 = arith.constant 0 : i32
    return %arg0, %c0_i32 : i32, i32
  }
}

module attributes {stable_mosaic.version = 11 : i64} {
  func.func @_attention_kernel(%arg0: i32, %arg1: i32, %arg2: memref<1x8x192xf32, #tpu.memory_space<vmem>>, %arg3: memref<1x8x192xf32, #tpu.memory_space<vmem>>, %arg4: memref<8x16xf32, #tpu.memory_space<vmem>>, %arg5: memref<8x16xf32, #tpu.memory_space<vmem>>, %arg6: memref<8x16xf32, #tpu.memory_space<vmem>>, %arg7: memref<8x16xf32, #tpu.memory_space<vmem>>, %arg8: memref<1x8x64xf32, #tpu.memory_space<vmem>>) attributes {dimension_semantics = [#tpu.dimension_semantics<parallel>, #tpu.dimension_semantics<parallel>], iteration_bounds = array<i64: 2, 1>, scalar_prefetch = 0 : i64, scratch_operands = 0 : i64, tpu.core_type = #tpu.core_type<tc>, window_params = [{transform_indices = @transform_0, window_bounds = array<i64: 1, 8, 192>}, {transform_indices = @transform_1, window_bounds = array<i64: 1, 8, 192>}, {transform_indices = @transform_2, window_bounds = array<i64: 8, 16>}, {transform_indices = @transform_3, window_bounds = array<i64: 8, 16>}, {pipeline_mode = #tpu.pipeline_mode<synchronous>, transform_indices = @transform_4, window_bounds = array<i64: 8, 16>}, {pipeline_mode = #tpu.pipeline_mode<synchronous>, transform_indices = @transform_5, window_bounds = array<i64: 8, 16>}, {transform_indices = @transform_6, window_bounds = array<i64: 1, 8, 64>}]} {
    %c0 = arith.constant 0 : index
    %c0_0 = arith.constant 0 : index
    %c0_1 = arith.constant 0 : index
    %0 = vector.load %arg2[%c0, %c0_0, %c0_1] : memref<1x8x192xf32, #tpu.memory_space<vmem>>, vector<1x8x192xf32>
    %1 = vector.shape_cast %0 : vector<1x8x192xf32> to vector<8x192xf32>
    %c0_2 = arith.constant 0 : index
    %c0_3 = arith.constant 0 : index
    %c0_4 = arith.constant 0 : index
    %2 = vector.load %arg3[%c0_2, %c0_3, %c0_4] : memref<1x8x192xf32, #tpu.memory_space<vmem>>, vector<1x8x192xf32>
    %3 = vector.shape_cast %2 : vector<1x8x192xf32> to vector<8x192xf32>
    %c0_5 = arith.constant 0 : index
    %c0_6 = arith.constant 0 : index
    %4 = vector.load %arg4[%c0_5, %c0_6] : memref<8x16xf32, #tpu.memory_space<vmem>>, vector<8x16xf32>
    %c0_7 = arith.constant 0 : index
    %c0_8 = arith.constant 0 : index
    %5 = vector.load %arg5[%c0_7, %c0_8] : memref<8x16xf32, #tpu.memory_space<vmem>>, vector<8x16xf32>
    %c0_9 = arith.constant 0 : index
    %c0_10 = arith.constant 0 : index
    %6 = vector.load %arg6[%c0_9, %c0_10] : memref<8x16xf32, #tpu.memory_space<vmem>>, vector<8x16xf32>
    %c0_11 = arith.constant 0 : index
    %c0_12 = arith.constant 0 : index
    %7 = vector.load %arg7[%c0_11, %c0_12] : memref<8x16xf32, #tpu.memory_space<vmem>>, vector<8x16xf32>
    %8 = vector.extract_strided_slice %1 {offsets = [0, 0], sizes = [8, 16], strides = [1, 1]} : vector<8x192xf32> to vector<8x16xf32>
    %9 = vector.extract_strided_slice %3 {offsets = [0, 64], sizes = [8, 16], strides = [1, 1]} : vector<8x192xf32> to vector<8x16xf32>
    %10 = vector.extract_strided_slice %3 {offsets = [0, 128], sizes = [8, 16], strides = [1, 1]} : vector<8x192xf32> to vector<8x16xf32>
    %11 = arith.mulf %8, %4 : vector<8x16xf32>
    %12 = vector.extract_strided_slice %8 {offsets = [0, 8], sizes = [8, 8], strides = [1, 1]} : vector<8x16xf32> to vector<8x8xf32>
    %13 = vector.extract_strided_slice %8 {offsets = [0, 0], sizes = [8, 8], strides = [1, 1]} : vector<8x16xf32> to vector<8x8xf32>
    %14 = tpu.concatenate %12, %13 in 1 : vector<8x8xf32>, vector<8x8xf32> -> vector<8x16xf32>
    %15 = arith.mulf %14, %5 : vector<8x16xf32>
    %16 = arith.addf %11, %15 : vector<8x16xf32>
    %17 = arith.mulf %9, %6 : vector<8x16xf32>
    %18 = vector.extract_strided_slice %9 {offsets = [0, 8], sizes = [8, 8], strides = [1, 1]} : vector<8x16xf32> to vector<8x8xf32>
    %19 = vector.extract_strided_slice %9 {offsets = [0, 0], sizes = [8, 8], strides = [1, 1]} : vector<8x16xf32> to vector<8x8xf32>
    %20 = tpu.concatenate %18, %19 in 1 : vector<8x8xf32>, vector<8x8xf32> -> vector<8x16xf32>
    %21 = arith.mulf %20, %7 : vector<8x16xf32>
    %22 = arith.addf %17, %21 : vector<8x16xf32>
    %23 = arith.truncf %16 : vector<8x16xf32> to vector<8x16xbf16>
    %24 = arith.truncf %22 : vector<8x16xf32> to vector<8x16xbf16>
    %cst = arith.constant dense<0.000000e+00> : vector<8x8xf32>
    %25 = tpu.matmul %23, %24, %cst {dimension_numbers = #tpu.dot_dimension_numbers<[1], [1], [0], [0], [0, 0, 1, 0], [], []>} : vector<8x16xbf16>, vector<8x16xbf16>, vector<8x8xf32> -> vector<8x8xf32>
    %cst_13 = arith.constant 2.500000e-01 : f32
    %26 = vector.broadcast %cst_13 : f32 to vector<8x8xf32>
    %27 = arith.mulf %25, %26 : vector<8x8xf32>
    %cst_14 = arith.constant dense<0xFF800000> : vector<8xf32>
    %28 = vector.multi_reduction <maximumf>, %27, %cst_14 [1] : vector<8x8xf32> to vector<8xf32>
    %29 = vector.shape_cast %28 : vector<8xf32> to vector<8x1xf32>
    %30 = vector.broadcast %29 : vector<8x1xf32> to vector<8x8xf32>
    %31 = arith.subf %27, %30 : vector<8x8xf32>
    %32 = math.exp %31 : vector<8x8xf32>
    %cst_15 = arith.constant dense<0.000000e+00> : vector<8xf32>
    %33 = vector.multi_reduction <add>, %32, %cst_15 [1] : vector<8x8xf32> to vector<8xf32>
    %34 = vector.shape_cast %33 : vector<8xf32> to vector<8x1xf32>
    %35 = vector.broadcast %34 : vector<8x1xf32> to vector<8x8xf32>
    %36 = arith.divf %32, %35 : vector<8x8xf32>
    %37 = arith.truncf %36 : vector<8x8xf32> to vector<8x8xbf16>
    %38 = arith.truncf %10 : vector<8x16xf32> to vector<8x16xbf16>
    %cst_16 = arith.constant dense<0.000000e+00> : vector<8x16xf32>
    %39 = tpu.matmul %37, %38, %cst_16 {dimension_numbers = #tpu.dot_dimension_numbers<[1], [0], [0], [1], [0, 0, 1, 1], [], []>} : vector<8x8xbf16>, vector<8x16xbf16>, vector<8x16xf32> -> vector<8x16xf32>
    %40 = vector.extract_strided_slice %1 {offsets = [0, 16], sizes = [8, 16], strides = [1, 1]} : vector<8x192xf32> to vector<8x16xf32>
    %41 = vector.extract_strided_slice %3 {offsets = [0, 80], sizes = [8, 16], strides = [1, 1]} : vector<8x192xf32> to vector<8x16xf32>
    %42 = vector.extract_strided_slice %3 {offsets = [0, 144], sizes = [8, 16], strides = [1, 1]} : vector<8x192xf32> to vector<8x16xf32>
    %43 = arith.mulf %40, %4 : vector<8x16xf32>
    %44 = vector.extract_strided_slice %40 {offsets = [0, 8], sizes = [8, 8], strides = [1, 1]} : vector<8x16xf32> to vector<8x8xf32>
    %45 = vector.extract_strided_slice %40 {offsets = [0, 0], sizes = [8, 8], strides = [1, 1]} : vector<8x16xf32> to vector<8x8xf32>
    %46 = tpu.concatenate %44, %45 in 1 : vector<8x8xf32>, vector<8x8xf32> -> vector<8x16xf32>
    %47 = arith.mulf %46, %5 : vector<8x16xf32>
    %48 = arith.addf %43, %47 : vector<8x16xf32>
    %49 = arith.mulf %41, %6 : vector<8x16xf32>
    %50 = vector.extract_strided_slice %41 {offsets = [0, 8], sizes = [8, 8], strides = [1, 1]} : vector<8x16xf32> to vector<8x8xf32>
    %51 = vector.extract_strided_slice %41 {offsets = [0, 0], sizes = [8, 8], strides = [1, 1]} : vector<8x16xf32> to vector<8x8xf32>
    %52 = tpu.concatenate %50, %51 in 1 : vector<8x8xf32>, vector<8x8xf32> -> vector<8x16xf32>
    %53 = arith.mulf %52, %7 : vector<8x16xf32>
    %54 = arith.addf %49, %53 : vector<8x16xf32>
    %55 = arith.truncf %48 : vector<8x16xf32> to vector<8x16xbf16>
    %56 = arith.truncf %54 : vector<8x16xf32> to vector<8x16xbf16>
    %cst_17 = arith.constant dense<0.000000e+00> : vector<8x8xf32>
    %57 = tpu.matmul %55, %56, %cst_17 {dimension_numbers = #tpu.dot_dimension_numbers<[1], [1], [0], [0], [0, 0, 1, 0], [], []>} : vector<8x16xbf16>, vector<8x16xbf16>, vector<8x8xf32> -> vector<8x8xf32>
    %cst_18 = arith.constant 2.500000e-01 : f32
    %58 = vector.broadcast %cst_18 : f32 to vector<8x8xf32>
    %59 = arith.mulf %57, %58 : vector<8x8xf32>
    %cst_19 = arith.constant dense<0xFF800000> : vector<8xf32>
    %60 = vector.multi_reduction <maximumf>, %59, %cst_19 [1] : vector<8x8xf32> to vector<8xf32>
    %61 = vector.shape_cast %60 : vector<8xf32> to vector<8x1xf32>
    %62 = vector.broadcast %61 : vector<8x1xf32> to vector<8x8xf32>
    %63 = arith.subf %59, %62 : vector<8x8xf32>
    %64 = math.exp %63 : vector<8x8xf32>
    %cst_20 = arith.constant dense<0.000000e+00> : vector<8xf32>
    %65 = vector.multi_reduction <add>, %64, %cst_20 [1] : vector<8x8xf32> to vector<8xf32>
    %66 = vector.shape_cast %65 : vector<8xf32> to vector<8x1xf32>
    %67 = vector.broadcast %66 : vector<8x1xf32> to vector<8x8xf32>
    %68 = arith.divf %64, %67 : vector<8x8xf32>
    %69 = arith.truncf %68 : vector<8x8xf32> to vector<8x8xbf16>
    %70 = arith.truncf %42 : vector<8x16xf32> to vector<8x16xbf16>
    %cst_21 = arith.constant dense<0.000000e+00> : vector<8x16xf32>
    %71 = tpu.matmul %69, %70, %cst_21 {dimension_numbers = #tpu.dot_dimension_numbers<[1], [0], [0], [1], [0, 0, 1, 1], [], []>} : vector<8x8xbf16>, vector<8x16xbf16>, vector<8x16xf32> -> vector<8x16xf32>
    %72 = vector.extract_strided_slice %1 {offsets = [0, 32], sizes = [8, 16], strides = [1, 1]} : vector<8x192xf32> to vector<8x16xf32>
    %73 = vector.extract_strided_slice %3 {offsets = [0, 96], sizes = [8, 16], strides = [1, 1]} : vector<8x192xf32> to vector<8x16xf32>
    %74 = vector.extract_strided_slice %3 {offsets = [0, 160], sizes = [8, 16], strides = [1, 1]} : vector<8x192xf32> to vector<8x16xf32>
    %75 = arith.mulf %72, %4 : vector<8x16xf32>
    %76 = vector.extract_strided_slice %72 {offsets = [0, 8], sizes = [8, 8], strides = [1, 1]} : vector<8x16xf32> to vector<8x8xf32>
    %77 = vector.extract_strided_slice %72 {offsets = [0, 0], sizes = [8, 8], strides = [1, 1]} : vector<8x16xf32> to vector<8x8xf32>
    %78 = tpu.concatenate %76, %77 in 1 : vector<8x8xf32>, vector<8x8xf32> -> vector<8x16xf32>
    %79 = arith.mulf %78, %5 : vector<8x16xf32>
    %80 = arith.addf %75, %79 : vector<8x16xf32>
    %81 = arith.mulf %73, %6 : vector<8x16xf32>
    %82 = vector.extract_strided_slice %73 {offsets = [0, 8], sizes = [8, 8], strides = [1, 1]} : vector<8x16xf32> to vector<8x8xf32>
    %83 = vector.extract_strided_slice %73 {offsets = [0, 0], sizes = [8, 8], strides = [1, 1]} : vector<8x16xf32> to vector<8x8xf32>
    %84 = tpu.concatenate %82, %83 in 1 : vector<8x8xf32>, vector<8x8xf32> -> vector<8x16xf32>
    %85 = arith.mulf %84, %7 : vector<8x16xf32>
    %86 = arith.addf %81, %85 : vector<8x16xf32>
    %87 = arith.truncf %80 : vector<8x16xf32> to vector<8x16xbf16>
    %88 = arith.truncf %86 : vector<8x16xf32> to vector<8x16xbf16>
    %cst_22 = arith.constant dense<0.000000e+00> : vector<8x8xf32>
    %89 = tpu.matmul %87, %88, %cst_22 {dimension_numbers = #tpu.dot_dimension_numbers<[1], [1], [0], [0], [0, 0, 1, 0], [], []>} : vector<8x16xbf16>, vector<8x16xbf16>, vector<8x8xf32> -> vector<8x8xf32>
    %cst_23 = arith.constant 2.500000e-01 : f32
    %90 = vector.broadcast %cst_23 : f32 to vector<8x8xf32>
    %91 = arith.mulf %89, %90 : vector<8x8xf32>
    %cst_24 = arith.constant dense<0xFF800000> : vector<8xf32>
    %92 = vector.multi_reduction <maximumf>, %91, %cst_24 [1] : vector<8x8xf32> to vector<8xf32>
    %93 = vector.shape_cast %92 : vector<8xf32> to vector<8x1xf32>
    %94 = vector.broadcast %93 : vector<8x1xf32> to vector<8x8xf32>
    %95 = arith.subf %91, %94 : vector<8x8xf32>
    %96 = math.exp %95 : vector<8x8xf32>
    %cst_25 = arith.constant dense<0.000000e+00> : vector<8xf32>
    %97 = vector.multi_reduction <add>, %96, %cst_25 [1] : vector<8x8xf32> to vector<8xf32>
    %98 = vector.shape_cast %97 : vector<8xf32> to vector<8x1xf32>
    %99 = vector.broadcast %98 : vector<8x1xf32> to vector<8x8xf32>
    %100 = arith.divf %96, %99 : vector<8x8xf32>
    %101 = arith.truncf %100 : vector<8x8xf32> to vector<8x8xbf16>
    %102 = arith.truncf %74 : vector<8x16xf32> to vector<8x16xbf16>
    %cst_26 = arith.constant dense<0.000000e+00> : vector<8x16xf32>
    %103 = tpu.matmul %101, %102, %cst_26 {dimension_numbers = #tpu.dot_dimension_numbers<[1], [0], [0], [1], [0, 0, 1, 1], [], []>} : vector<8x8xbf16>, vector<8x16xbf16>, vector<8x16xf32> -> vector<8x16xf32>
    %104 = vector.extract_strided_slice %1 {offsets = [0, 48], sizes = [8, 16], strides = [1, 1]} : vector<8x192xf32> to vector<8x16xf32>
    %105 = vector.extract_strided_slice %3 {offsets = [0, 112], sizes = [8, 16], strides = [1, 1]} : vector<8x192xf32> to vector<8x16xf32>
    %106 = vector.extract_strided_slice %3 {offsets = [0, 176], sizes = [8, 16], strides = [1, 1]} : vector<8x192xf32> to vector<8x16xf32>
    %107 = arith.mulf %104, %4 : vector<8x16xf32>
    %108 = vector.extract_strided_slice %104 {offsets = [0, 8], sizes = [8, 8], strides = [1, 1]} : vector<8x16xf32> to vector<8x8xf32>
    %109 = vector.extract_strided_slice %104 {offsets = [0, 0], sizes = [8, 8], strides = [1, 1]} : vector<8x16xf32> to vector<8x8xf32>
    %110 = tpu.concatenate %108, %109 in 1 : vector<8x8xf32>, vector<8x8xf32> -> vector<8x16xf32>
    %111 = arith.mulf %110, %5 : vector<8x16xf32>
    %112 = arith.addf %107, %111 : vector<8x16xf32>
    %113 = arith.mulf %105, %6 : vector<8x16xf32>
    %114 = vector.extract_strided_slice %105 {offsets = [0, 8], sizes = [8, 8], strides = [1, 1]} : vector<8x16xf32> to vector<8x8xf32>
    %115 = vector.extract_strided_slice %105 {offsets = [0, 0], sizes = [8, 8], strides = [1, 1]} : vector<8x16xf32> to vector<8x8xf32>
    %116 = tpu.concatenate %114, %115 in 1 : vector<8x8xf32>, vector<8x8xf32> -> vector<8x16xf32>
    %117 = arith.mulf %116, %7 : vector<8x16xf32>
    %118 = arith.addf %113, %117 : vector<8x16xf32>
    %119 = arith.truncf %112 : vector<8x16xf32> to vector<8x16xbf16>
    %120 = arith.truncf %118 : vector<8x16xf32> to vector<8x16xbf16>
    %cst_27 = arith.constant dense<0.000000e+00> : vector<8x8xf32>
    %121 = tpu.matmul %119, %120, %cst_27 {dimension_numbers = #tpu.dot_dimension_numbers<[1], [1], [0], [0], [0, 0, 1, 0], [], []>} : vector<8x16xbf16>, vector<8x16xbf16>, vector<8x8xf32> -> vector<8x8xf32>
    %cst_28 = arith.constant 2.500000e-01 : f32
    %122 = vector.broadcast %cst_28 : f32 to vector<8x8xf32>
    %123 = arith.mulf %121, %122 : vector<8x8xf32>
    %cst_29 = arith.constant dense<0xFF800000> : vector<8xf32>
    %124 = vector.multi_reduction <maximumf>, %123, %cst_29 [1] : vector<8x8xf32> to vector<8xf32>
    %125 = vector.shape_cast %124 : vector<8xf32> to vector<8x1xf32>
    %126 = vector.broadcast %125 : vector<8x1xf32> to vector<8x8xf32>
    %127 = arith.subf %123, %126 : vector<8x8xf32>
    %128 = math.exp %127 : vector<8x8xf32>
    %cst_30 = arith.constant dense<0.000000e+00> : vector<8xf32>
    %129 = vector.multi_reduction <add>, %128, %cst_30 [1] : vector<8x8xf32> to vector<8xf32>
    %130 = vector.shape_cast %129 : vector<8xf32> to vector<8x1xf32>
    %131 = vector.broadcast %130 : vector<8x1xf32> to vector<8x8xf32>
    %132 = arith.divf %128, %131 : vector<8x8xf32>
    %133 = arith.truncf %132 : vector<8x8xf32> to vector<8x8xbf16>
    %134 = arith.truncf %106 : vector<8x16xf32> to vector<8x16xbf16>
    %cst_31 = arith.constant dense<0.000000e+00> : vector<8x16xf32>
    %135 = tpu.matmul %133, %134, %cst_31 {dimension_numbers = #tpu.dot_dimension_numbers<[1], [0], [0], [1], [0, 0, 1, 1], [], []>} : vector<8x8xbf16>, vector<8x16xbf16>, vector<8x16xf32> -> vector<8x16xf32>
    %136 = tpu.concatenate %39, %71, %103, %135 in 1 : vector<8x16xf32>, vector<8x16xf32>, vector<8x16xf32>, vector<8x16xf32> -> vector<8x64xf32>
    %c0_32 = arith.constant 0 : index
    %c0_33 = arith.constant 0 : index
    %c0_34 = arith.constant 0 : index
    %137 = vector.load %arg8[%c0_32, %c0_33, %c0_34] : memref<1x8x64xf32, #tpu.memory_space<vmem>>, vector<1x8x64xf32>
    %138 = vector.shape_cast %137 : vector<1x8x64xf32> to vector<8x64xf32>
    %139 = vector.shape_cast %136 : vector<8x64xf32> to vector<1x8x64xf32>
    tpu.vector_store %arg8[%c0_32, %c0_33, %c0_34], %139 {strides = array<i32>} : memref<1x8x64xf32, #tpu.memory_space<vmem>>, vector<1x8x64xf32>,
    return
  }
  func.func @transform_0(%arg0: i32, %arg1: i32) -> (i32, i32, i32) {
    %c0_i32 = arith.constant 0 : i32
    %c0_i32_0 = arith.constant 0 : i32
    return %arg0, %arg1, %c0_i32 : i32, i32, i32
  }
  func.func @transform_1(%arg0: i32, %arg1: i32) -> (i32, i32, i32) {
    %c0_i32 = arith.constant 0 : i32
    %c0_i32_0 = arith.constant 0 : i32
    %c0_i32_1 = arith.constant 0 : i32
    return %arg0, %c0_i32, %c0_i32_0 : i32, i32, i32
  }
  func.func @transform_2(%arg0: i32, %arg1: i32) -> (i32, i32) {
    %c0_i32 = arith.constant 0 : i32
    %c0_i32_0 = arith.constant 0 : i32
    return %arg1, %c0_i32 : i32, i32
  }
  func.func @transform_3(%arg0: i32, %arg1: i32) -> (i32, i32) {
    %c0_i32 = arith.constant 0 : i32
    %c0_i32_0 = arith.constant 0 : i32
    return %arg1, %c0_i32 : i32, i32
  }
  func.func @transform_4(%arg0: i32, %arg1: i32) -> (i32, i32) {
    %c0_i32 = arith.constant 0 : i32
    %c0_i32_0 = arith.constant 0 : i32
    %c0_i32_1 = arith.constant 0 : i32
    return %c0_i32, %c0_i32_0 : i32, i32
  }
  func.func @transform_5(%arg0: i32, %arg1: i32) -> (i32, i32) {
    %c0_i32 = arith.constant 0 : i32
    %c0_i32_0 = arith.constant 0 : i32
    %c0_i32_1 = arith.constant 0 : i32
    return %c0_i32, %c0_i32_0 : i32, i32
  }
  func.func @transform_6(%arg0: i32, %arg1: i32) -> (i32, i32, i32) {
    %c0_i32 = arith.constant 0 : i32
    %c0_i32_0 = arith.constant 0 : i32
    return %arg0, %arg1, %c0_i32 : i32, i32, i32
  }
}

module attributes {stable_mosaic.version = 11 : i64} {
  func.func @_fused_linear_kernel(%arg0: i32, %arg1: memref<8x64xf32, #tpu.memory_space<vmem>>, %arg2: memref<1x64xf32, #tpu.memory_space<vmem>>, %arg3: memref<64x256xf32, #tpu.memory_space<vmem>>, %arg4: memref<1x256xf32, #tpu.memory_space<vmem>>, %arg5: memref<8x256xf32, #tpu.memory_space<vmem>>) attributes {dimension_semantics = [#tpu.dimension_semantics<parallel>], iteration_bounds = array<i64: 2>, scalar_prefetch = 0 : i64, scratch_operands = 0 : i64, tpu.core_type = #tpu.core_type<tc>, window_params = [{transform_indices = @transform_0, window_bounds = array<i64: 8, 64>}, {pipeline_mode = #tpu.pipeline_mode<synchronous>, transform_indices = @transform_1, window_bounds = array<i64: 1, 64>}, {pipeline_mode = #tpu.pipeline_mode<synchronous>, transform_indices = @transform_2, window_bounds = array<i64: 64, 256>}, {pipeline_mode = #tpu.pipeline_mode<synchronous>, transform_indices = @transform_3, window_bounds = array<i64: 1, 256>}, {transform_indices = @transform_4, window_bounds = array<i64: 8, 256>}]} {
    %c0 = arith.constant 0 : index
    %c0_0 = arith.constant 0 : index
    %0 = vector.load %arg1[%c0, %c0_0] : memref<8x64xf32, #tpu.memory_space<vmem>>, vector<8x64xf32>
    %c0_1 = arith.constant 0 : index
    %c0_2 = arith.constant 0 : index
    %1 = vector.load %arg2[%c0_1, %c0_2] : memref<1x64xf32, #tpu.memory_space<vmem>>, vector<1x64xf32>
    %2 = arith.mulf %0, %0 : vector<8x64xf32>
    %cst = arith.constant dense<0.000000e+00> : vector<8xf32>
    %3 = vector.multi_reduction <add>, %2, %cst [1] : vector<8x64xf32> to vector<8xf32>
    %4 = vector.shape_cast %3 : vector<8xf32> to vector<8x1xf32>
    %cst_3 = arith.constant 1.000000e-24 : f32
    %5 = vector.broadcast %cst_3 : f32 to vector<8x1xf32>
    %6 = arith.addf %4, %5 : vector<8x1xf32>
    %7 = math.rsqrt %6 : vector<8x1xf32>
    %cst_4 = arith.constant 8.000000e+00 : f32
    %8 = vector.broadcast %cst_4 : f32 to vector<8x1xf32>
    %9 = arith.mulf %8, %7 : vector<8x1xf32>
    %10 = vector.broadcast %9 : vector<8x1xf32> to vector<8x64xf32>
    %11 = arith.mulf %0, %10 : vector<8x64xf32>
    %12 = vector.broadcast %1 : vector<1x64xf32> to vector<8x64xf32>
    %13 = arith.mulf %11, %12 : vector<8x64xf32>
    %c0_5 = arith.constant 0 : index
    %c0_6 = arith.constant 0 : index
    %14 = vector.load %arg3[%c0_5, %c0_6] : memref<64x256xf32, #tpu.memory_space<vmem>>, vector<64x256xf32>
    %15 = arith.truncf %13 : vector<8x64xf32> to vector<8x64xbf16>
    %16 = arith.truncf %14 : vector<64x256xf32> to vector<64x256xbf16>
    %cst_7 = arith.constant dense<0.000000e+00> : vector<8x256xf32>
    %17 = tpu.matmul %15, %16, %cst_7 {dimension_numbers = #tpu.dot_dimension_numbers<[1], [0], [0], [1], [0, 0, 1, 1], [], []>} : vector<8x64xbf16>, vector<64x256xbf16>, vector<8x256xf32> -> vector<8x256xf32>
    %c0_8 = arith.constant 0 : index
    %c0_9 = arith.constant 0 : index
    %18 = vector.load %arg4[%c0_8, %c0_9] : memref<1x256xf32, #tpu.memory_space<vmem>>, vector<1x256xf32>
    %19 = vector.broadcast %18 : vector<1x256xf32> to vector<8x256xf32>
    %20 = arith.addf %17, %19 : vector<8x256xf32>
    %21 = arith.mulf %20, %20 : vector<8x256xf32>
    %22 = arith.mulf %20, %21 : vector<8x256xf32>
    %cst_10 = arith.constant 4.471500e-02 : f32
    %23 = vector.broadcast %cst_10 : f32 to vector<8x256xf32>
    %24 = arith.mulf %23, %22 : vector<8x256xf32>
    %25 = arith.addf %20, %24 : vector<8x256xf32>
    %cst_11 = arith.constant 0.797884583 : f32
    %26 = vector.broadcast %cst_11 : f32 to vector<8x256xf32>
    %27 = arith.mulf %26, %25 : vector<8x256xf32>
    %28 = math.tanh %27 : vector<8x256xf32>
    %cst_12 = arith.constant 1.000000e+00 : f32
    %29 = vector.broadcast %cst_12 : f32 to vector<8x256xf32>
    %30 = arith.addf %29, %28 : vector<8x256xf32>
    %cst_13 = arith.constant 5.000000e-01 : f32
    %31 = vector.broadcast %cst_13 : f32 to vector<8x256xf32>
    %32 = arith.mulf %31, %30 : vector<8x256xf32>
    %33 = arith.mulf %20, %32 : vector<8x256xf32>
    %c0_14 = arith.constant 0 : index
    %c0_15 = arith.constant 0 : index
    %34 = vector.load %arg5[%c0_14, %c0_15] : memref<8x256xf32, #tpu.memory_space<vmem>>, vector<8x256xf32>
    tpu.vector_store %arg5[%c0_14, %c0_15], %33 {strides = array<i32>} : memref<8x256xf32, #tpu.memory_space<vmem>>, vector<8x256xf32>,
    return
  }
  func.func @transform_0(%arg0: i32) -> (i32, i32) {
    %c0_i32 = arith.constant 0 : i32
    %c0_i32_0 = arith.constant 0 : i32
    return %arg0, %c0_i32 : i32, i32
  }
  func.func @transform_1(%arg0: i32) -> (i32, i32) {
    %c0_i32 = arith.constant 0 : i32
    %c0_i32_0 = arith.constant 0 : i32
    %c0_i32_1 = arith.constant 0 : i32
    return %c0_i32, %c0_i32_0 : i32, i32
  }
  func.func @transform_2(%arg0: i32) -> (i32, i32) {
    %c0_i32 = arith.constant 0 : i32
    %c0_i32_0 = arith.constant 0 : i32
    %c0_i32_1 = arith.constant 0 : i32
    return %c0_i32, %c0_i32_0 : i32, i32
  }
  func.func @transform_3(%arg0: i32) -> (i32, i32) {
    %c0_i32 = arith.constant 0 : i32
    %c0_i32_0 = arith.constant 0 : i32
    %c0_i32_1 = arith.constant 0 : i32
    return %c0_i32, %c0_i32_0 : i32, i32
  }
  func.func @transform_4(%arg0: i32) -> (i32, i32) {
    %c0_i32 = arith.constant 0 : i32
    %c0_i32_0 = arith.constant 0 : i32
    return %arg0, %c0_i32 : i32, i32
  }
}

module attributes {stable_mosaic.version = 11 : i64} {
  func.func @_fused_linear_kernel(%arg0: i32, %arg1: memref<8x256xf32, #tpu.memory_space<vmem>>, %arg2: memref<256x64xf32, #tpu.memory_space<vmem>>, %arg3: memref<1x64xf32, #tpu.memory_space<vmem>>, %arg4: memref<8x64xf32, #tpu.memory_space<vmem>>, %arg5: memref<8x64xf32, #tpu.memory_space<vmem>>) attributes {dimension_semantics = [#tpu.dimension_semantics<parallel>], iteration_bounds = array<i64: 2>, scalar_prefetch = 0 : i64, scratch_operands = 0 : i64, tpu.core_type = #tpu.core_type<tc>, window_params = [{transform_indices = @transform_0, window_bounds = array<i64: 8, 256>}, {pipeline_mode = #tpu.pipeline_mode<synchronous>, transform_indices = @transform_1, window_bounds = array<i64: 256, 64>}, {pipeline_mode = #tpu.pipeline_mode<synchronous>, transform_indices = @transform_2, window_bounds = array<i64: 1, 64>}, {transform_indices = @transform_3, window_bounds = array<i64: 8, 64>}, {transform_indices = @transform_4, window_bounds = array<i64: 8, 64>}]} {
    %c0 = arith.constant 0 : index
    %c0_0 = arith.constant 0 : index
    %0 = vector.load %arg1[%c0, %c0_0] : memref<8x256xf32, #tpu.memory_space<vmem>>, vector<8x256xf32>
    %c0_1 = arith.constant 0 : index
    %c0_2 = arith.constant 0 : index
    %1 = vector.load %arg2[%c0_1, %c0_2] : memref<256x64xf32, #tpu.memory_space<vmem>>, vector<256x64xf32>
    %2 = arith.truncf %0 : vector<8x256xf32> to vector<8x256xbf16>
    %3 = arith.truncf %1 : vector<256x64xf32> to vector<256x64xbf16>
    %cst = arith.constant dense<0.000000e+00> : vector<8x64xf32>
    %4 = tpu.matmul %2, %3, %cst {dimension_numbers = #tpu.dot_dimension_numbers<[1], [0], [0], [1], [0, 0, 1, 1], [], []>} : vector<8x256xbf16>, vector<256x64xbf16>, vector<8x64xf32> -> vector<8x64xf32>
    %c0_3 = arith.constant 0 : index
    %c0_4 = arith.constant 0 : index
    %5 = vector.load %arg3[%c0_3, %c0_4] : memref<1x64xf32, #tpu.memory_space<vmem>>, vector<1x64xf32>
    %6 = vector.broadcast %5 : vector<1x64xf32> to vector<8x64xf32>
    %7 = arith.addf %4, %6 : vector<8x64xf32>
    %c0_5 = arith.constant 0 : index
    %c0_6 = arith.constant 0 : index
    %8 = vector.load %arg4[%c0_5, %c0_6] : memref<8x64xf32, #tpu.memory_space<vmem>>, vector<8x64xf32>
    %9 = arith.addf %7, %8 : vector<8x64xf32>
    %c0_7 = arith.constant 0 : index
    %c0_8 = arith.constant 0 : index
    %10 = vector.load %arg5[%c0_7, %c0_8] : memref<8x64xf32, #tpu.memory_space<vmem>>, vector<8x64xf32>
    tpu.vector_store %arg5[%c0_7, %c0_8], %9 {strides = array<i32>} : memref<8x64xf32, #tpu.memory_space<vmem>>, vector<8x64xf32>,
    return
  }
  func.func @transform_0(%arg0: i32) -> (i32, i32) {
    %c0_i32 = arith.constant 0 : i32
    %c0_i32_0 = arith.constant 0 : i32
    return %arg0, %c0_i32 : i32, i32
  }
  func.func @transform_1(%arg0: i32) -> (i32, i32) {
    %c0_i32 = arith.constant 0 : i32
    %c0_i32_0 = arith.constant 0 : i32
    %c0_i32_1 = arith.constant 0 : i32
    return %c0_i32, %c0_i32_0 : i32, i32
  }
  func.func @transform_2(%arg0: i32) -> (i32, i32) {
    %c0_i32 = arith.constant 0 : i32
    %c0_i32_0 = arith.constant 0 : i32
    %c0_i32_1 = arith.constant 0 : i32
    return %c0_i32, %c0_i32_0 : i32, i32
  }
  func.func @transform_3(%arg0: i32) -> (i32, i32) {
    %c0_i32 = arith.constant 0 : i32
    %c0_i32_0 = arith.constant 0 : i32
    return %arg0, %c0_i32 : i32, i32
  }
  func.func @transform_4(%arg0: i32) -> (i32, i32) {
    %c0_i32 = arith.constant 0 : i32
    %c0_i32_0 = arith.constant 0 : i32
    return %arg0, %c0_i32 : i32, i32
  }
}

module attributes {stable_mosaic.version = 11 : i64} {
  func.func @_fused_linear_kernel(%arg0: i32, %arg1: memref<8x128xf32, #tpu.memory_space<vmem>>, %arg2: memref<128x64xf32, #tpu.memory_space<vmem>>, %arg3: memref<1x64xf32, #tpu.memory_space<vmem>>, %arg4: memref<8x64xf32, #tpu.memory_space<vmem>>) attributes {dimension_semantics = [#tpu.dimension_semantics<parallel>], iteration_bounds = array<i64: 2>, scalar_prefetch = 0 : i64, scratch_operands = 0 : i64, tpu.core_type = #tpu.core_type<tc>, window_params = [{transform_indices = @transform_0, window_bounds = array<i64: 8, 128>}, {pipeline_mode = #tpu.pipeline_mode<synchronous>, transform_indices = @transform_1, window_bounds = array<i64: 128, 64>}, {pipeline_mode = #tpu.pipeline_mode<synchronous>, transform_indices = @transform_2, window_bounds = array<i64: 1, 64>}, {transform_indices = @transform_3, window_bounds = array<i64: 8, 64>}]} {
    %c0 = arith.constant 0 : index
    %c0_0 = arith.constant 0 : index
    %0 = vector.load %arg1[%c0, %c0_0] : memref<8x128xf32, #tpu.memory_space<vmem>>, vector<8x128xf32>
    %c0_1 = arith.constant 0 : index
    %c0_2 = arith.constant 0 : index
    %1 = vector.load %arg2[%c0_1, %c0_2] : memref<128x64xf32, #tpu.memory_space<vmem>>, vector<128x64xf32>
    %2 = arith.truncf %0 : vector<8x128xf32> to vector<8x128xbf16>
    %3 = arith.truncf %1 : vector<128x64xf32> to vector<128x64xbf16>
    %cst = arith.constant dense<0.000000e+00> : vector<8x64xf32>
    %4 = tpu.matmul %2, %3, %cst {dimension_numbers = #tpu.dot_dimension_numbers<[1], [0], [0], [1], [0, 0, 1, 1], [], []>} : vector<8x128xbf16>, vector<128x64xbf16>, vector<8x64xf32> -> vector<8x64xf32>
    %c0_3 = arith.constant 0 : index
    %c0_4 = arith.constant 0 : index
    %5 = vector.load %arg3[%c0_3, %c0_4] : memref<1x64xf32, #tpu.memory_space<vmem>>, vector<1x64xf32>
    %6 = vector.broadcast %5 : vector<1x64xf32> to vector<8x64xf32>
    %7 = arith.addf %4, %6 : vector<8x64xf32>
    %c0_5 = arith.constant 0 : index
    %c0_6 = arith.constant 0 : index
    %8 = vector.load %arg4[%c0_5, %c0_6] : memref<8x64xf32, #tpu.memory_space<vmem>>, vector<8x64xf32>
    tpu.vector_store %arg4[%c0_5, %c0_6], %7 {strides = array<i32>} : memref<8x64xf32, #tpu.memory_space<vmem>>, vector<8x64xf32>,
    return
  }
  func.func @transform_0(%arg0: i32) -> (i32, i32) {
    %c0_i32 = arith.constant 0 : i32
    %c0_i32_0 = arith.constant 0 : i32
    return %arg0, %c0_i32 : i32, i32
  }
  func.func @transform_1(%arg0: i32) -> (i32, i32) {
    %c0_i32 = arith.constant 0 : i32
    %c0_i32_0 = arith.constant 0 : i32
    %c0_i32_1 = arith.constant 0 : i32
    return %c0_i32, %c0_i32_0 : i32, i32
  }
  func.func @transform_2(%arg0: i32) -> (i32, i32) {
    %c0_i32 = arith.constant 0 : i32
    %c0_i32_0 = arith.constant 0 : i32
    %c0_i32_1 = arith.constant 0 : i32
    return %c0_i32, %c0_i32_0 : i32, i32
  }
  func.func @transform_3(%arg0: i32) -> (i32, i32) {
    %c0_i32 = arith.constant 0 : i32
    %c0_i32_0 = arith.constant 0 : i32
    return %arg0, %c0_i32 : i32, i32
  }
}

module attributes {stable_mosaic.version = 11 : i64} {
  func.func @_fused_linear_kernel(%arg0: i32, %arg1: memref<8x64xf32, #tpu.memory_space<vmem>>, %arg2: memref<1x64xf32, #tpu.memory_space<vmem>>, %arg3: memref<64x128xf32, #tpu.memory_space<vmem>>, %arg4: memref<1x128xf32, #tpu.memory_space<vmem>>, %arg5: memref<8x128xf32, #tpu.memory_space<vmem>>) attributes {dimension_semantics = [#tpu.dimension_semantics<parallel>], iteration_bounds = array<i64: 2>, scalar_prefetch = 0 : i64, scratch_operands = 0 : i64, tpu.core_type = #tpu.core_type<tc>, window_params = [{transform_indices = @transform_0, window_bounds = array<i64: 8, 64>}, {pipeline_mode = #tpu.pipeline_mode<synchronous>, transform_indices = @transform_1, window_bounds = array<i64: 1, 64>}, {pipeline_mode = #tpu.pipeline_mode<synchronous>, transform_indices = @transform_2, window_bounds = array<i64: 64, 128>}, {pipeline_mode = #tpu.pipeline_mode<synchronous>, transform_indices = @transform_3, window_bounds = array<i64: 1, 128>}, {transform_indices = @transform_4, window_bounds = array<i64: 8, 128>}]} {
    %c0 = arith.constant 0 : index
    %c0_0 = arith.constant 0 : index
    %0 = vector.load %arg1[%c0, %c0_0] : memref<8x64xf32, #tpu.memory_space<vmem>>, vector<8x64xf32>
    %c0_1 = arith.constant 0 : index
    %c0_2 = arith.constant 0 : index
    %1 = vector.load %arg2[%c0_1, %c0_2] : memref<1x64xf32, #tpu.memory_space<vmem>>, vector<1x64xf32>
    %2 = arith.mulf %0, %0 : vector<8x64xf32>
    %cst = arith.constant dense<0.000000e+00> : vector<8xf32>
    %3 = vector.multi_reduction <add>, %2, %cst [1] : vector<8x64xf32> to vector<8xf32>
    %4 = vector.shape_cast %3 : vector<8xf32> to vector<8x1xf32>
    %cst_3 = arith.constant 1.000000e-24 : f32
    %5 = vector.broadcast %cst_3 : f32 to vector<8x1xf32>
    %6 = arith.addf %4, %5 : vector<8x1xf32>
    %7 = math.rsqrt %6 : vector<8x1xf32>
    %cst_4 = arith.constant 8.000000e+00 : f32
    %8 = vector.broadcast %cst_4 : f32 to vector<8x1xf32>
    %9 = arith.mulf %8, %7 : vector<8x1xf32>
    %10 = vector.broadcast %9 : vector<8x1xf32> to vector<8x64xf32>
    %11 = arith.mulf %0, %10 : vector<8x64xf32>
    %12 = vector.broadcast %1 : vector<1x64xf32> to vector<8x64xf32>
    %13 = arith.mulf %11, %12 : vector<8x64xf32>
    %c0_5 = arith.constant 0 : index
    %c0_6 = arith.constant 0 : index
    %14 = vector.load %arg3[%c0_5, %c0_6] : memref<64x128xf32, #tpu.memory_space<vmem>>, vector<64x128xf32>
    %15 = arith.truncf %13 : vector<8x64xf32> to vector<8x64xbf16>
    %16 = arith.truncf %14 : vector<64x128xf32> to vector<64x128xbf16>
    %cst_7 = arith.constant dense<0.000000e+00> : vector<8x128xf32>
    %17 = tpu.matmul %15, %16, %cst_7 {dimension_numbers = #tpu.dot_dimension_numbers<[1], [0], [0], [1], [0, 0, 1, 1], [], []>} : vector<8x64xbf16>, vector<64x128xbf16>, vector<8x128xf32> -> vector<8x128xf32>
    %c0_8 = arith.constant 0 : index
    %c0_9 = arith.constant 0 : index
    %18 = vector.load %arg4[%c0_8, %c0_9] : memref<1x128xf32, #tpu.memory_space<vmem>>, vector<1x128xf32>
    %19 = vector.broadcast %18 : vector<1x128xf32> to vector<8x128xf32>
    %20 = arith.addf %17, %19 : vector<8x128xf32>
    %c0_10 = arith.constant 0 : index
    %c0_11 = arith.constant 0 : index
    %21 = vector.load %arg5[%c0_10, %c0_11] : memref<8x128xf32, #tpu.memory_space<vmem>>, vector<8x128xf32>
    tpu.vector_store %arg5[%c0_10, %c0_11], %20 {strides = array<i32>} : memref<8x128xf32, #tpu.memory_space<vmem>>, vector<8x128xf32>,
    return
  }
  func.func @transform_0(%arg0: i32) -> (i32, i32) {
    %c0_i32 = arith.constant 0 : i32
    %c0_i32_0 = arith.constant 0 : i32
    return %arg0, %c0_i32 : i32, i32
  }
  func.func @transform_1(%arg0: i32) -> (i32, i32) {
    %c0_i32 = arith.constant 0 : i32
    %c0_i32_0 = arith.constant 0 : i32
    %c0_i32_1 = arith.constant 0 : i32
    return %c0_i32, %c0_i32_0 : i32, i32
  }
  func.func @transform_2(%arg0: i32) -> (i32, i32) {
    %c0_i32 = arith.constant 0 : i32
    %c0_i32_0 = arith.constant 0 : i32
    %c0_i32_1 = arith.constant 0 : i32
    return %c0_i32, %c0_i32_0 : i32, i32
  }
  func.func @transform_3(%arg0: i32) -> (i32, i32) {
    %c0_i32 = arith.constant 0 : i32
    %c0_i32_0 = arith.constant 0 : i32
    %c0_i32_1 = arith.constant 0 : i32
    return %c0_i32, %c0_i32_0 : i32, i32
  }
  func.func @transform_4(%arg0: i32) -> (i32, i32) {
    %c0_i32 = arith.constant 0 : i32
    %c0_i32_0 = arith.constant 0 : i32
    return %arg0, %c0_i32 : i32, i32
  }
}

</mosaic_0001>

<bundles_post_ra>
// kernel: duration_predictor_forward.15
= control target key start
LH: loop header
LB: loop body
LE: loop exit
PB: predicated region body
PF: predicated region fallthrough
CT: control target
= control target key end

     0   :  { %s351_s9 = smov 0   ;;  %s374_s0 = inlined_call_operand.vmem [shape: s32[16,1], index: 0, kind: input, shape index: {}]   ;;  %s375_s1 = inlined_call_operand.vmem [shape: f32[11,64], index: 1, kind: input, shape index: {}]   ;;  %s376_s2 = inlined_call_operand.vmem [shape: f32[16,64], index: 2, kind: output, shape index: {}]  }
   0x1 LB: > { %s283_s10 = sadd.s32 4294967295, %s329_s9   ;;  %p287_p0 = scmp.ge.s32.totalorder %s329_s9, 1  ;;  %s329_s9 = sphi %s351_s9, %s12_s9  }
   0x2   : > { %p111_p1 = scmp.lt.s32.totalorder %s329_s9, 3 }
   0x4   : > { %p112_p2 = pnand %p287_p0, %p111_p1 }
   0x5   : > { %p131_p3 = scmp.lt.s32.totalorder (!%p112_p2), %s283_s10, 1  ;;  %v148_v0 = vld [vmem:[%s375_s1] sm:$0xff] (!%p112_p2)  ;;  %v149_v1 = vld [vmem:[%s375_s1 + $0x8] sm:$0x7] (!%p112_p2)  ;;  %v331_v2 = vmov (!%p112_p2), 0   ;;  %v332_v3 = vmov (!%p112_p2), 0.0|0.0   ;;  %v140_v7 = vlaneseq (!%p112_p2) }
   0x6   : > { %115 = sbr.rel (%p112_p2) target bundleno = 360 (0x168), region = 28  ;;  %322 = vset.pattern.permute.xlu0 (!%p112_p2), %v331_v2  ;;  %305 = vmatprep.subr.bf16.mxu0 (!%p112_p2), %v332_v3  ;;  %vm154_vm0 = vcmask (!%p112_p2), 1042432   ;;  %v306_v4 = vpack.c.bf16 (!%p112_p2), %v149_v1, %v148_v0  ;;  %vm333_vm1 = vmmov (!%p112_p2), 1   ;;  %vm334_vm3 = vmmov (!%p112_p2), 0  }
   0x7   : > { %vm307_vm2 = vmpackc.low (!%p112_p2), %vm154_vm0, %vm333_vm1  ;;  %v335_v6 = vmov (!%p112_p2), 0.0   ;;  %v141_v8 = vand.u32 (!%p112_p2), 127, %v140_v7  ;;  %vm150_vm4 = vcmask (!%p112_p2), 89088   ;;  %vm228_vm6 = vcmask (!%p112_p2), 523264  }
   0x8   : > { %308 = vmatpush3.bf16.msk.msra.mxu0 (!%p112_p2), %vm307_vm2, %v306_v4  ;;  %302 = vmatprep.mubr.msk.f32.mxu0 (!%p112_p2), %vm334_vm3, %v335_v6 }
   0xd   : > { %s378_s10 = smov (!%p131_p3, %s283_s10), 1 }
   0xe   : > { %s288_s15 = sshll.u32 %s378_s10, 3 }
   0xf   : > { %s134_s18 = scalar_lea.vmem %s374_s0, %s288_s15  ;;  %s138_s21 = scalar_lea.vmem %s376_s2, %s288_s15 }
  0x10   : > { %v139_v5 = vld [vmem:[%s134_s18] sm:$0xff] }
  0x11   : > { %143 = vperm.xlu0 %322, %v139_v5  }
  0x90   : > { %v144_v9 = vpop.permute.xlu0 %143 }
  0x91   : > { %vm145_vm5 = vcmp.eq.s32.totalorder %v144_v9, %v141_v8 }
  0x92   : > { %v290_v10 = vsel %vm145_vm5, 1.0, %v335_v6 }
  0x93   : > { %303 = vmatmul.mubr.msk.f32.vlgmr.msra.gmra.mrb[0].mxu0 %vm150_vm4, %v290_v10 }
 0x166   : > { %v224_v11 = vpop.f32.mrb[0].mxu0 }
 0x167   : > { %229 = vst.msk [vmem:[%s138_s21] sm:$0xff] %vm228_vm6, %v224_v11  ;;  %v304_v12 = vpop.f32.mrb[1].mxu0 }
 0x168 PF: > { %s12_s9 = sadd.s32 1, %s329_s9  }
 0x169   : > { %p9_p4 = scmp.ge.s32.totalorder %s12_s9, 4  }
 0x16b   :  { %11 = sbr.rel (!%p9_p4) target bundleno = 1 (0x1), region = 58 }

// kernel: duration_predictor_forward.18
= control target key start
LH: loop header
LB: loop body
LE: loop exit
PB: predicated region body
PF: predicated region fallthrough
CT: control target
= control target key end

     0   :  { %s366_s12 = smov 0   ;;  %s441_s0 = inlined_call_operand.vmem [shape: f32[16,64], index: 0, kind: input, shape index: {}]   ;;  %s442_s1 = inlined_call_operand.vmem [shape: f32[1,64], index: 1, kind: input, shape index: {}]   ;;  %s443_s2 = inlined_call_operand.vmem [shape: f32[64,192], index: 2, kind: input, shape index: {}]   ;;  %s444_s3 = inlined_call_operand.vmem [shape: f32[16,192], index: 3, kind: output, shape index: {}]  }
   0x1 LB: > { %s313_s13 = sadd.s32 4294967295, %s343_s12   ;;  %p317_p0 = scmp.ge.s32.totalorder %s343_s12, 1  ;;  %s343_s12 = sphi %s366_s12, %s13_s12  }
   0x2   : > { %p136_p1 = scmp.lt.s32.totalorder %s343_s12, 3 }
   0x4   : > { %p137_p2 = pnand %p317_p0, %p136_p1 }
   0x5   : > { %p159_p3 = scmp.lt.s32.totalorder (!%p137_p2), %s313_s13, 1  ;;  %vm172_vm0 = vcmask (!%p137_p2), 523264   ;;  %v188_v3 = vld [vmem:[%s443_s2 + $0x8] sm:$0xff] (!%p137_p2)  ;;  %v190_v4 = vld [vmem:[%s443_s2 + $0x18] sm:$0xff] (!%p137_p2)  ;;  %v187_v6 = vld [vmem:[%s443_s2] sm:$0xff] (!%p137_p2)  ;;  %v345_v27 = vmov (!%p137_p2), 0  }
   0x6   : > { %140 = sbr.rel (%p137_p2) target bundleno = 398 (0x18e), region = 32  ;;  %v205_v5 = vpack.c.bf16 (!%p137_p2), %v190_v4, %v188_v3  ;;  %v189_v7 = vld [vmem:[%s443_s2 + $0x10] sm:$0xff] (!%p137_p2)  ;;  %v192_v9 = vld [vmem:[%s443_s2 + $0x28] sm:$0xff] (!%p137_p2)  ;;  %v194_v10 = vld [vmem:[%s443_s2 + $0x38] sm:$0xff] (!%p137_p2)  ;;  %247 = vmatprep.mubr.bf16.mxu0 (!%p137_p2), %v345_v27 }
   0x7   : > { %v204_v8 = vpack.c.bf16 (!%p137_p2), %v189_v7, %v187_v6  ;;  %v207_v11 = vpack.c.bf16 (!%p137_p2), %v194_v10, %v192_v9  ;;  %v191_v12 = vld [vmem:[%s443_s2 + $0x20] sm:$0xff] (!%p137_p2)  ;;  %v193_v13 = vld [vmem:[%s443_s2 + $0x30] sm:$0xff] (!%p137_p2)  ;;  %v196_v15 = vld [vmem:[%s443_s2 + $0x48] sm:$0xff] (!%p137_p2) }
   0x8   : > { %215 = vmatprep.subr.bf16.mxu0 (!%p137_p2), %v205_v5  ;;  %v206_v14 = vpack.c.bf16 (!%p137_p2), %v193_v13, %v191_v12  ;;  %v198_v16 = vld [vmem:[%s443_s2 + $0x58] sm:$0xff] (!%p137_p2)  ;;  %v195_v18 = vld [vmem:[%s443_s2 + $0x40] sm:$0xff] (!%p137_p2)  ;;  %v197_v19 = vld [vmem:[%s443_s2 + $0x50] sm:$0xff] (!%p137_p2) }
   0x9   : > { %216 = vmatpush1.bf16.msra.mxu0 (!%p137_p2), %v204_v8  ;;  %v209_v17 = vpack.c.bf16 (!%p137_p2), %v198_v16, %v196_v15  ;;  %v208_v20 = vpack.c.bf16 (!%p137_p2), %v197_v19, %v195_v18  ;;  %v200_v21 = vld [vmem:[%s443_s2 + $0x68] sm:$0xff] (!%p137_p2)  ;;  %v202_v22 = vld [vmem:[%s443_s2 + $0x78] sm:$0xff] (!%p137_p2)  ;;  %v199_v24 = vld [vmem:[%s443_s2 + $0x60] sm:$0xff] (!%p137_p2) }
   0xa   : > { %217 = vmatprep.subr.bf16.mxu0 (!%p137_p2), %v207_v11  ;;  %v211_v23 = vpack.c.bf16 (!%p137_p2), %v202_v22, %v200_v21  ;;  %v201_v25 = vld [vmem:[%s443_s2 + $0x70] sm:$0xff] (!%p137_p2)  ;;  %v321_v32 = vld [vmem:[%s442_s1] ss:$0 sm:$0xff] (!%p137_p2) }
   0xb   : > { %v210_v26 = vpack.c.bf16 (!%p137_p2), %v201_v25, %v199_v24 }
   0xd   : > { %s446_s13 = smov (!%p159_p3, %s313_s13), 1  ;;  %218 = vmatpush1.bf16.msra.mxu0 %v206_v14 }
   0xe   : > { %s318_s14 = sshll.u32 %s446_s13, 3  ;;  %219 = vmatprep.subr.bf16.mxu0 %v209_v17  ;;  %s325_s27 = sshll.u32 %s446_s13, 4 }
   0xf   : > { %s162_s17 = scalar_lea.vmem %s441_s0, %s318_s14  ;;  %s167_s30 = scalar_lea.vmem %s444_s3, %s325_s27 }
  0x10   : > { %v169_v0 = vld [vmem:[%s162_s17] sm:$0xff] }
  0x11   : > { %v171_v1 = vmul.f32 %v169_v0, %v169_v0  ;;  %220 = vmatpush1.bf16.msra.mxu0 %v208_v20 }
  0x12   : > { %221 = vmatprep.subr.bf16.mxu0 %v211_v23 }
  0x13   : > { %v173_v2 = vsel %vm172_vm0, %v171_v1, 0.0 }
  0x14   : > { %174 = vadd.xlane.f32.xlu0 %v173_v2 }
  0x15   : > { %222 = vmatpush1.bf16.msra.mxu0 %v210_v26 }
  0xa1   : > { %v175_v28 = vpop.xlane.xlu0 %174 }
  0xa2   : > { %v176_v29 = vadd.f32 1e-24, %v175_v28 }
  0xa4   : > { %335 = vrsqrt.f32 %v176_v29 }
  0xae   : > { %v336_v30 = vpop.eup %335 }
  0xaf   : > { %v178_v31 = vmul.f32 8.0, %v336_v30 }
  0xb1   : > { %v179_v33 = vmul.f32 %v178_v31, %v169_v0 }
  0xb3   : > { %v186_v34 = vmul.f32 %v321_v32, %v179_v33 }
  0xb5   : > { %v203_v35 = vpack.c.bf16 %v186_v34, %v186_v34 }
  0xb7   : > { %322 = vmatmul.mubr.msk.bf16.vlgmr.msra.gmra.mrb[0].mxu0 %vm172_vm0, %v203_v35 }
 0x18a   : > { %v249_v36 = vpop.f32.mrb[0].mxu0 }
 0x18b   : > { %256 = vst [vmem:[%s167_s30] sm:$0xff] %v249_v36  ;;  %v251_v37 = vpop.f32.mrb[1].mxu0 }
 0x18c   : > { %257 = vst.msk [vmem:[%s167_s30 + $0x8] sm:$0xff] %vm172_vm0, %v251_v37  ;;  %v253_v38 = vpop.f32.mrb[2].mxu0 }
 0x18d   : > { %v254_v39 = vpop.f32.mrb[3].mxu0 }
 0x18e PF: > { %s13_s12 = sadd.s32 1, %s343_s12  }
 0x18f   : > { %p10_p4 = scmp.ge.s32.totalorder %s13_s12, 4  }
 0x191   :  { %12 = sbr.rel (!%p10_p4) target bundleno = 1 (0x1), region = 62 }

// kernel: duration_predictor_forward.17
= control target key start
LH: loop header
LB: loop body
LE: loop exit
PB: predicated region body
PF: predicated region fallthrough
CT: control target
= control target key end

     0   :  { %s391_s12 = smov 0   ;;  %s441_s0 = inlined_call_operand.vmem [shape: f32[2,14,64], index: 0, kind: input, shape index: {}]   ;;  %s442_s1 = inlined_call_operand.vmem [shape: f32[7,64], index: 1, kind: input, shape index: {}]   ;;  %s443_s2 = inlined_call_operand.vmem [shape: f32[1,64], index: 2, kind: input, shape index: {}]   ;;  %s444_s3 = inlined_call_operand.vmem [shape: f32[2,8,64], index: 3, kind: output, shape index: {}]  }
   0x1 LB: > { %s341_s13 = sadd.s32 4294967295, %s369_s12   ;;  %p345_p0 = scmp.ge.s32.totalorder %s369_s12, 1  ;;  %s369_s12 = sphi %s391_s12, %s13_s12  }
   0x2   : > { %p137_p1 = scmp.lt.s32.totalorder %s369_s12, 3 }
   0x4   : > { %p138_p2 = pnand %p345_p0, %p137_p1 }
   0x5   : > { %p160_p3 = scmp.lt.s32.totalorder (!%p138_p2), %s341_s13, 1  ;;  %v173_v0 = vlaneseq (!%p138_p2)  ;;  %v171_v2 = vld [vmem:[%s442_s1] sm:$0x7f] (!%p138_p2)  ;;  %vm187_vm0 = vcmask (!%p138_p2), 1046528   ;;  %vm201_vm1 = vcmask (!%p138_p2), 1045504   ;;  %vm215_vm2 = vcmask (!%p138_p2), 1044480  }
   0x6   : > { %141 = sbr.rel (%p138_p2) target bundleno = 66 (0x42), region = 32  ;;  %vm229_vm3 = vcmask (!%p138_p2), 1043456   ;;  %vm243_vm4 = vcmask (!%p138_p2), 1042432   ;;  %vm257_vm5 = vcmask (!%p138_p2), 1041408   ;;  %v349_v55 = vld [vmem:[%s443_s2] ss:$0 sm:$0xff] (!%p138_p2) }
   0x7   : > { %v174_v1 = vshrl.u32 (!%p138_p2), %v173_v0, 7  ;;  %vm286_vm6 = vcmask (!%p138_p2), 523264  }
   0x9   : > { %v175_v3 = vsub.s32 (!%p138_p2), 0, %v174_v1  ;;  %v181_v4 = vsub.s32 (!%p138_p2), 1, %v174_v1  ;;  %v195_v5 = vsub.s32 (!%p138_p2), 2, %v174_v1  ;;  %v209_v6 = vsub.s32 (!%p138_p2), 3, %v174_v1 }
   0xa   : > { %v223_v7 = vsub.s32 (!%p138_p2), 4, %v174_v1  ;;  %v237_v8 = vsub.s32 (!%p138_p2), 5, %v174_v1  ;;  %v251_v9 = vsub.s32 (!%p138_p2), 6, %v174_v1 }
   0xb   : > { %v176_v12 = vrot.slane (!%p138_p2), %v171_v2, %v175_v3  ;;  %v182_v13 = vrot.slane (!%p138_p2), %v171_v2, %v181_v4  ;;  %v196_v14 = vrot.slane (!%p138_p2), %v171_v2, %v195_v5  ;;  %v210_v15 = vrot.slane (!%p138_p2), %v171_v2, %v209_v6 }
   0xc   : > { %v224_v16 = vrot.slane (!%p138_p2), %v171_v2, %v223_v7  ;;  %v238_v17 = vrot.slane (!%p138_p2), %v171_v2, %v237_v8  ;;  %v252_v18 = vrot.slane (!%p138_p2), %v171_v2, %v251_v9 }
   0xd   : > { %s446_s13 = smov (!%p160_p3, %s341_s13), 1 }
   0xe   : > { %s352_s16 = sshll.u32 %s446_s13, 4  ;;  %s348_s22 = sshll.u32 %s446_s13, 3 }
   0xf   : > { %s164_s19 = scalar_lea.vmem %s441_s0, %s352_s16  ;;  %s168_s25 = scalar_lea.vmem %s444_s3, %s348_s22 }
  0x10   : > { %v408_v10 = vld [vmem:[%s164_s19] sm:$0xff]  ;;  %v410_v11 = vld [vmem:[%s164_s19 + $0x8] sm:$0x3f] }
  0x11   : > { %v177_v19 = vmul.f32 %v176_v12, %v408_v10  ;;  %v183_v20 = vmul.f32 %v182_v13, %v408_v10  ;;  %v184_v21 = vmul.f32 %v182_v13, %v410_v11  ;;  %v197_v22 = vmul.f32 %v196_v14, %v408_v10 }
  0x12   : > { %v198_v23 = vmul.f32 %v196_v14, %v410_v11  ;;  %v211_v24 = vmul.f32 %v210_v15, %v408_v10  ;;  %v212_v25 = vmul.f32 %v210_v15, %v410_v11  ;;  %v225_v26 = vmul.f32 %v224_v16, %v408_v10 }
  0x13   : > { %v188_v27 = vrot.slane %v183_v20, 1  ;;  %v189_v28 = vrot.slane %v184_v21, 1  ;;  %v202_v29 = vrot.slane %v197_v22, 2  ;;  %v226_v30 = vmul.f32 %v224_v16, %v410_v11 }
  0x14   : > { %v203_v31 = vrot.slane %v198_v23, 2  ;;  %v216_v32 = vrot.slane %v211_v24, 3  ;;  %v217_v33 = vrot.slane %v212_v25, 3  ;;  %v230_v34 = vrot.slane %v225_v26, 4 }
  0x15   : > { %v190_v35 = vsel %vm187_vm0, %v188_v27, %v189_v28  ;;  %v231_v36 = vrot.slane %v226_v30, 4  ;;  %v239_v37 = vmul.f32 %v238_v17, %v408_v10  ;;  %v240_v38 = vmul.f32 %v238_v17, %v410_v11 }
  0x16   : > { %v192_v39 = vadd.f32 %v190_v35, %v177_v19  ;;  %v204_v40 = vsel %vm201_vm1, %v202_v29, %v203_v31  ;;  %v253_v41 = vmul.f32 %v252_v18, %v408_v10  ;;  %v218_v42 = vsel %vm215_vm2, %v216_v32, %v217_v33 }
  0x17   : > { %v244_v43 = vrot.slane %v239_v37, 5  ;;  %v245_v44 = vrot.slane %v240_v38, 5  ;;  %v254_v45 = vmul.f32 %v252_v18, %v410_v11  ;;  %v232_v47 = vsel %vm229_vm3, %v230_v34, %v231_v36 }
  0x18   : > { %v206_v46 = vadd.f32 %v204_v40, %v192_v39  ;;  %v258_v48 = vrot.slane %v253_v41, 6  ;;  %v281_v0 = vrot.slane %v408_v10, 3  ;;  %v282_v1 = vrot.slane %v410_v11, 3 }
  0x19   : > { %v259_v49 = vrot.slane %v254_v45, 6  ;;  %v246_v51 = vsel %vm243_vm4, %v244_v43, %v245_v44 }
  0x1a   : > { %v220_v50 = vadd.f32 %v218_v42, %v206_v46  ;;  %v283_v4 = vsel %vm215_vm2, %v281_v0, %v282_v1 }
  0x1b   : > { %v260_v53 = vsel %vm257_vm5, %v258_v48, %v259_v49 }
  0x1c   : > { %v234_v52 = vadd.f32 %v232_v47, %v220_v50 }
  0x1e   : > { %v248_v54 = vadd.f32 %v246_v51, %v234_v52 }
  0x20   : > { %v262_v56 = vadd.f32 %v260_v53, %v248_v54 }
  0x22   : > { %v269_v57 = vadd.f32 %v349_v55, %v262_v56 }
  0x24   : > { %v270_v58 = vmul.f32 %v269_v57, %v269_v57 }
  0x26   : > { %v271_v59 = vmul.f32 %v270_v58, %v269_v57 }
  0x28   : > { %v272_v60 = vmul.f32 0.044715, %v271_v59 }
  0x2a   : > { %v273_v61 = vadd.f32 %v272_v60, %v269_v57 }
  0x2c   : > { %v274_v62 = vmul.f32 0.7978846, %v273_v61 }
  0x2e   : > { %361 = vtanh.f32 %v274_v62 }
  0x38   : > { %v362_v63 = vpop.eup %361 }
  0x39   : > { %v276_v2 = vadd.f32 1.0, %v362_v63 }
  0x3b   : > { %v277_v3 = vmul.f32 0.5, %v276_v2 }
  0x3d   : > { %v278_v5 = vmul.f32 %v277_v3, %v269_v57 }
  0x3f   : > { %v285_v6 = vadd.f32 %v283_v4, %v278_v5 }
  0x41   : > { %287 = vst.msk [vmem:[%s168_s25] sm:$0xff] %vm286_vm6, %v285_v6 }
  0x42 PF: > { %s13_s12 = sadd.s32 1, %s369_s12  }
  0x43   : > { %p10_p4 = scmp.ge.s32.totalorder %s13_s12, 4  }
  0x45   :  { %12 = sbr.rel (!%p10_p4) target bundleno = 1 (0x1), region = 62 }

// kernel: duration_predictor_forward.16
= control target key start
LH: loop header
LB: loop body
LE: loop exit
PB: predicated region body
PF: predicated region fallthrough
CT: control target
= control target key end

     0   :  { %s366_s12 = smov 0   ;;  %s480_s0 = inlined_call_operand.vmem [shape: f32[16,192], index: 0, kind: input, shape index: {}]   ;;  %s481_s1 = inlined_call_operand.vmem [shape: f32[192,64], index: 1, kind: input, shape index: {}]   ;;  %s482_s2 = inlined_call_operand.vmem [shape: f32[1,64], index: 2, kind: input, shape index: {}]   ;;  %s483_s3 = inlined_call_operand.vmem [shape: f32[16,64], index: 3, kind: output, shape index: {}]  }
   0x1 LB: > { %s315_s13 = sadd.s32 4294967295, %s343_s12   ;;  %p319_p0 = scmp.ge.s32.totalorder %s343_s12, 1  ;;  %s343_s12 = sphi %s366_s12, %s13_s12  }
   0x2   : > { %p137_p1 = scmp.lt.s32.totalorder %s343_s12, 3 }
   0x4   : > { %p138_p2 = pnand %p319_p0, %p137_p1 }
   0x5   : > { %v172_v0 = vld [vmem:[%s481_s1] sm:$0xff] (!%p138_p2)  ;;  %v173_v1 = vld [vmem:[%s481_s1 + $0x8] sm:$0xff] (!%p138_p2)  ;;  %v174_v2 = vld [vmem:[%s481_s1 + $0x10] sm:$0xff] (!%p138_p2)  ;;  %p160_p3 = scmp.lt.s32.totalorder (!%p138_p2), %s315_s13, 1  ;;  %v345_v3 = vmov (!%p138_p2), 0   ;;  %vm217_vm0 = vcmask (!%p138_p2), 523264  }
   0x6   : > { %141 = sbr.rel (%p138_p2) target bundleno = 270 (0x10e), region = 32  ;;  %221 = vmatprep.subr.bf16.mxu0 (!%p138_p2), %v345_v3  ;;  %v198_v4 = vpack.c.bf16 (!%p138_p2), %v173_v1, %v172_v0  ;;  %v175_v5 = vld [vmem:[%s481_s1 + $0x18] sm:$0xff] (!%p138_p2)  ;;  %v176_v7 = vld [vmem:[%s481_s1 + $0x20] sm:$0xff] (!%p138_p2)  ;;  %v177_v8 = vld [vmem:[%s481_s1 + $0x28] sm:$0xff] (!%p138_p2) }
   0x7   : > { %v199_v6 = vpack.c.bf16 (!%p138_p2), %v175_v5, %v174_v2  ;;  %v200_v9 = vpack.c.bf16 (!%p138_p2), %v177_v8, %v176_v7  ;;  %v178_v10 = vld [vmem:[%s481_s1 + $0x30] sm:$0xff] (!%p138_p2)  ;;  %v179_v11 = vld [vmem:[%s481_s1 + $0x38] sm:$0xff] (!%p138_p2)  ;;  %v180_v15 = vld [vmem:[%s481_s1 + $0x40] sm:$0xff] (!%p138_p2) }
   0x8   : > { %222 = vmatpush1.bf16.msra.mxu0 (!%p138_p2), %v198_v4  ;;  %v201_v14 = vpack.c.bf16 (!%p138_p2), %v179_v11, %v178_v10  ;;  %v181_v16 = vld [vmem:[%s481_s1 + $0x48] sm:$0xff] (!%p138_p2)  ;;  %v182_v18 = vld [vmem:[%s481_s1 + $0x50] sm:$0xff] (!%p138_p2)  ;;  %v183_v19 = vld [vmem:[%s481_s1 + $0x58] sm:$0xff] (!%p138_p2) }
   0x9   : > { %223 = vmatprep.subr.bf16.mxu0 (!%p138_p2), %v345_v3  ;;  %v202_v17 = vpack.c.bf16 (!%p138_p2), %v181_v16, %v180_v15  ;;  %v203_v20 = vpack.c.bf16 (!%p138_p2), %v183_v19, %v182_v18  ;;  %v184_v21 = vld [vmem:[%s481_s1 + $0x60] sm:$0xff] (!%p138_p2)  ;;  %v185_v22 = vld [vmem:[%s481_s1 + $0x68] sm:$0xff] (!%p138_p2)  ;;  %v186_v24 = vld [vmem:[%s481_s1 + $0x70] sm:$0xff] (!%p138_p2) }
   0xa   : > { %v204_v23 = vpack.c.bf16 (!%p138_p2), %v185_v22, %v184_v21  ;;  %v187_v25 = vld [vmem:[%s481_s1 + $0x78] sm:$0xff] (!%p138_p2)  ;;  %v188_v27 = vld [vmem:[%s481_s1 + $0x80] sm:$0xff] (!%p138_p2)  ;;  %v189_v28 = vld [vmem:[%s481_s1 + $0x88] sm:$0xff] (!%p138_p2) }
   0xb   : > { %v205_v26 = vpack.c.bf16 (!%p138_p2), %v187_v25, %v186_v24  ;;  %v206_v29 = vpack.c.bf16 (!%p138_p2), %v189_v28, %v188_v27  ;;  %v190_v30 = vld [vmem:[%s481_s1 + $0x90] sm:$0xff] (!%p138_p2)  ;;  %v191_v31 = vld [vmem:[%s481_s1 + $0x98] sm:$0xff] (!%p138_p2)  ;;  %v192_v33 = vld [vmem:[%s481_s1 + $0xa0] sm:$0xff] (!%p138_p2) }
   0xc   : > { %224 = vmatpush1.bf16.msra.mxu0 (!%p138_p2), %v199_v6  ;;  %v207_v32 = vpack.c.bf16 (!%p138_p2), %v191_v31, %v190_v30  ;;  %v193_v34 = vld [vmem:[%s481_s1 + $0xa8] sm:$0xff] (!%p138_p2)  ;;  %v194_v36 = vld [vmem:[%s481_s1 + $0xb0] sm:$0xff] (!%p138_p2)  ;;  %v195_v37 = vld [vmem:[%s481_s1 + $0xb8] sm:$0xff] (!%p138_p2) }
   0xd   : > { %s485_s13 = smov (!%p160_p3, %s315_s13), 1  ;;  %225 = vmatprep.subr.bf16.mxu0 %v345_v3  ;;  %v208_v35 = vpack.c.bf16 %v193_v34, %v192_v33  ;;  %v209_v38 = vpack.c.bf16 %v195_v37, %v194_v36  ;;  %v323_v41 = vld [vmem:[%s482_s2] ss:$0 sm:$0xff] }
   0xe   : > { %s327_s26 = sshll.u32 %s485_s13, 4  ;;  %s322_s17 = sshll.u32 %s485_s13, 3 }
   0xf   : > { %s400_s29 = scalar_lea.vmem %s480_s0, %s327_s26  ;;  %s168_s22 = scalar_lea.vmem %s483_s3, %s322_s17 }
  0x10   : > { %v171_v12 = vld [vmem:[%s400_s29 + $0x8] sm:$0xff]  ;;  %226 = vmatpush1.bf16.msra.mxu0 %v200_v9  ;;  %v170_v39 = vld [vmem:[%s400_s29] sm:$0xff] }
  0x11   : > { %v197_v13 = vpack.c.bf16 %v171_v12, %v171_v12  ;;  %227 = vmatprep.subr.bf16.mxu0 %v345_v3  ;;  %v196_v40 = vpack.c.bf16 %v170_v39, %v170_v39 }
  0x13   : > { %324 = vmatprep.mubr.msk.bf16.mxu0 %vm217_vm0, %v197_v13 }
  0x14   : > { %228 = vmatpush1.bf16.msra.mxu0 %v201_v14 }
  0x15   : > { %229 = vmatprep.subr.bf16.mxu0 %v345_v3 }
  0x18   : > { %230 = vmatpush1.bf16.msra.mxu0 %v202_v17 }
  0x19   : > { %231 = vmatprep.subr.bf16.mxu0 %v345_v3 }
  0x1c   : > { %232 = vmatpush1.bf16.msra.mxu0 %v203_v20 }
  0x1d   : > { %233 = vmatprep.subr.bf16.mxu0 %v345_v3 }
  0x20   : > { %234 = vmatpush1.bf16.msra.mxu0 %v204_v23 }
  0x21   : > { %235 = vmatprep.subr.bf16.mxu0 %v345_v3 }
  0x24   : > { %236 = vmatpush1.bf16.msra.mxu0 %v205_v26 }
  0x25   : > { %237 = vmatprep.subr.bf16.mxu0 %v345_v3 }
  0x28   : > { %238 = vmatpush1.bf16.msra.mxu0 %v206_v29 }
  0x29   : > { %239 = vmatprep.subr.bf16.mxu0 %v345_v3 }
  0x2c   : > { %240 = vmatpush1.bf16.msra.mxu0 %v207_v32 }
  0x2d   : > { %241 = vmatprep.subr.bf16.mxu0 %v345_v3 }
  0x30   : > { %242 = vmatpush1.bf16.msra.mxu0 %v208_v35 }
  0x31   : > { %243 = vmatprep.subr.bf16.mxu0 %v345_v3 }
  0x34   : > { %244 = vmatpush1.bf16.msra.mxu0 %v209_v38 }
  0x37   : > { %254 = vmatmul.mubr.bf16.vlgmr.msra.gmra.mrb[0].mxu0 %v196_v40 }
 0x10a   : > { %v255_v42 = vpop.f32.mrb[0].mxu0 }
 0x10b   : > { %v256_v43 = vadd.f32 %v323_v41, %v255_v42  ;;  %v257_v44 = vpop.f32.mrb[1].mxu0 }
 0x10c   : > { %v258_v45 = vpop.f32.mrb[2].mxu0 }
 0x10d   : > { %261 = vst.msk [vmem:[%s168_s22] sm:$0xff] %vm217_vm0, %v256_v43  ;;  %v259_v46 = vpop.f32.mrb[3].mxu0 }
 0x10e PF: > { %s13_s12 = sadd.s32 1, %s343_s12  }
 0x10f   : > { %p10_p4 = scmp.ge.s32.totalorder %s13_s12, 4  }
 0x111   :  { %12 = sbr.rel (!%p10_p4) target bundleno = 1 (0x1), region = 62 }

// kernel: duration_predictor_forward.20
= control target key start
LH: loop header
LB: loop body
LE: loop exit
PB: predicated region body
PF: predicated region fallthrough
CT: control target
= control target key end

     0   :  { %s377_s12 = smov 0   ;;  %s421_s0 = inlined_call_operand.vmem [shape: f32[16,64], index: 0, kind: input, shape index: {}]   ;;  %s422_s1 = inlined_call_operand.vmem [shape: f32[64,64], index: 1, kind: input, shape index: {}]   ;;  %s423_s2 = inlined_call_operand.vmem [shape: f32[16,64], index: 2, kind: input, shape index: {}]   ;;  %s424_s3 = inlined_call_operand.vmem [shape: f32[16,64], index: 3, kind: output, shape index: {}]  }
   0x1 LB: > { %s309_s13 = sadd.s32 4294967295, %s353_s12   ;;  %p313_p0 = scmp.ge.s32.totalorder %s353_s12, 1  ;;  %s353_s12 = sphi %s377_s12, %s13_s12  }
   0x2   : > { %p145_p1 = scmp.lt.s32.totalorder %s353_s12, 3 }
   0x4   : > { %p146_p2 = pnand %p313_p0, %p145_p1 }
   0x5   : > { %v185_v0 = vld [vmem:[%s422_s1] sm:$0xff] (!%p146_p2)  ;;  %v186_v1 = vld [vmem:[%s422_s1 + $0x8] sm:$0xff] (!%p146_p2)  ;;  %v187_v2 = vld [vmem:[%s422_s1 + $0x10] sm:$0xff] (!%p146_p2)  ;;  %p171_p3 = scmp.lt.s32.totalorder (!%p146_p2), %s309_s13, 1  ;;  %v355_v3 = vmov (!%p146_p2), 0.0   ;;  %vm356_vm0 = vmmov (!%p146_p2), 0  }
   0x6   : > { %149 = sbr.rel (%p146_p2) target bundleno = 238 (0xee), region = 32  ;;  %325 = vmatprep.subr.bf16.mxu0 (!%p146_p2), %v355_v3  ;;  %v194_v4 = vpack.c.bf16 (!%p146_p2), %v186_v1, %v185_v0  ;;  %v188_v5 = vld [vmem:[%s422_s1 + $0x18] sm:$0xff] (!%p146_p2)  ;;  %333 = vmatprep.mubr.msk.bf16.mxu0 (!%p146_p2), %vm356_vm0, %v355_v3  ;;  %v189_v7 = vld [vmem:[%s422_s1 + $0x20] sm:$0xff] (!%p146_p2)  ;;  %v190_v8 = vld [vmem:[%s422_s1 + $0x28] sm:$0xff] (!%p146_p2)  ;;  %vm199_vm1 = vcmask (!%p146_p2), 523264  }
   0x7   : > { %v195_v6 = vpack.c.bf16 (!%p146_p2), %v188_v5, %v187_v2  ;;  %v196_v9 = vpack.c.bf16 (!%p146_p2), %v190_v8, %v189_v7  ;;  %v191_v10 = vld [vmem:[%s422_s1 + $0x30] sm:$0xff] (!%p146_p2)  ;;  %v192_v11 = vld [vmem:[%s422_s1 + $0x38] sm:$0xff] (!%p146_p2) }
   0x8   : > { %326 = vmatpush3.bf16.msra.mxu0 (!%p146_p2), %v194_v4  ;;  %v197_v12 = vpack.c.bf16 (!%p146_p2), %v192_v11, %v191_v10 }
   0x9   : > { %327 = vmatprep.subr.bf16.mxu0 (!%p146_p2), %v355_v3 }
   0xc   : > { %328 = vmatpush3.bf16.msra.mxu0 (!%p146_p2), %v195_v6 }
   0xd   : > { %s426_s13 = smov (!%p171_p3, %s309_s13), 1  ;;  %329 = vmatprep.subr.bf16.mxu0 %v355_v3 }
   0xe   : > { %s314_s26 = sshll.u32 %s426_s13, 3 }
   0xf   : > { %s174_s6 = scalar_lea.vmem %s421_s0, %s314_s26  ;;  %s178_s9 = scalar_lea.vmem %s423_s2, %s314_s26 }
  0x10   : > { %330 = vmatpush3.bf16.msra.mxu0 %v196_v9  ;;  %v184_v13 = vld [vmem:[%s174_s6] sm:$0xff]  ;;  %s182_s13 = scalar_lea.vmem %s424_s3, %s314_s26 }
  0x11   : > { %331 = vmatprep.subr.bf16.mxu0 %v355_v3  ;;  %v193_v14 = vpack.c.bf16 %v184_v13, %v184_v13  ;;  %v198_v15 = vld [vmem:[%s178_s9] sm:$0xff] }
  0x14   : > { %332 = vmatpush3.bf16.msra.mxu0 %v197_v12 }
  0x17   : > { %334 = vmatmul.mubr.msk.bf16.vlgmr.msra.gmra.mrb[0].mxu0 %vm199_vm1, %v193_v14 }
  0xea   : > { %v237_v16 = vpop.f32.mrb[0].mxu0 }
  0xeb   : > { %v238_v17 = vadd.f32 %v237_v16, %v198_v15  ;;  %v335_v18 = vpop.f32.mrb[1].mxu0 }
  0xec   : > { %v240_v19 = vpop.f32.mrb[2].mxu0 }
  0xed   : > { %243 = vst.msk [vmem:[%s182_s13] sm:$0xff] %vm199_vm1, %v238_v17  ;;  %v336_v20 = vpop.f32.mrb[3].mxu0 }
  0xee PF: > { %s13_s12 = sadd.s32 1, %s353_s12  }
  0xef   : > { %p10_p4 = scmp.ge.s32.totalorder %s13_s12, 4  }
  0xf1   :  { %12 = sbr.rel (!%p10_p4) target bundleno = 1 (0x1), region = 65 }

// kernel: duration_predictor_forward.21
= control target key start
LH: loop header
LB: loop body
LE: loop exit
PB: predicated region body
PF: predicated region fallthrough
CT: control target
= control target key end

     0   :  { %s432_s15 = smov 0   ;;  %s509_s0 = inlined_call_operand.vmem [shape: f32[16,64], index: 0, kind: input, shape index: {}]   ;;  %s510_s1 = inlined_call_operand.vmem [shape: f32[1,64], index: 1, kind: input, shape index: {}]   ;;  %s511_s2 = inlined_call_operand.vmem [shape: f32[64,256], index: 2, kind: input, shape index: {}]   ;;  %s512_s3 = inlined_call_operand.vmem [shape: f32[1,256], index: 3, kind: input, shape index: {}]   ;;  %s513_s4 = inlined_call_operand.vmem [shape: f32[16,256], index: 4, kind: output, shape index: {}]  }
   0x1 LB: > { %s370_s16 = sadd.s32 4294967295, %s404_s15   ;;  %p374_p0 = scmp.ge.s32.totalorder %s404_s15, 1  ;;  %s404_s15 = sphi %s432_s15, %s14_s15  }
   0x2   : > { %p161_p1 = scmp.lt.s32.totalorder %s404_s15, 3 }
   0x4   : > { %p162_p2 = pnand %p374_p0, %p161_p1 }
   0x5   : > { %p186_p3 = scmp.lt.s32.totalorder (!%p162_p2), %s370_s16, 1  ;;  %vm199_vm0 = vcmask (!%p162_p2), 523264   ;;  %v215_v3 = vld [vmem:[%s511_s2 + $0x8] sm:$0xff] (!%p162_p2)  ;;  %v217_v4 = vld [vmem:[%s511_s2 + $0x18] sm:$0xff] (!%p162_p2)  ;;  %v214_v6 = vld [vmem:[%s511_s2] sm:$0xff] (!%p162_p2)  ;;  %v406_v27 = vmov (!%p162_p2), 0   ;;  %v241_v36 = vlaneseq (!%p162_p2) }
   0x6   : > { %165 = sbr.rel (%p162_p2) target bundleno = 426 (0x1aa), region = 36  ;;  %v232_v5 = vpack.c.bf16 (!%p162_p2), %v217_v4, %v215_v3  ;;  %v216_v7 = vld [vmem:[%s511_s2 + $0x10] sm:$0xff] (!%p162_p2)  ;;  %v219_v9 = vld [vmem:[%s511_s2 + $0x28] sm:$0xff] (!%p162_p2)  ;;  %v221_v10 = vld [vmem:[%s511_s2 + $0x38] sm:$0xff] (!%p162_p2)  ;;  %286 = vmatprep.mubr.bf16.mxu0 (!%p162_p2), %v406_v27 }
   0x7   : > { %v231_v8 = vpack.c.bf16 (!%p162_p2), %v216_v7, %v214_v6  ;;  %v234_v11 = vpack.c.bf16 (!%p162_p2), %v221_v10, %v219_v9  ;;  %v218_v12 = vld [vmem:[%s511_s2 + $0x20] sm:$0xff] (!%p162_p2)  ;;  %v220_v13 = vld [vmem:[%s511_s2 + $0x30] sm:$0xff] (!%p162_p2)  ;;  %v223_v15 = vld [vmem:[%s511_s2 + $0x48] sm:$0xff] (!%p162_p2)  ;;  %v242_v37 = vshrl.u32 (!%p162_p2), %v241_v36, 7 }
   0x8   : > { %254 = vmatprep.subr.bf16.mxu0 (!%p162_p2), %v232_v5  ;;  %v233_v14 = vpack.c.bf16 (!%p162_p2), %v220_v13, %v218_v12  ;;  %v225_v16 = vld [vmem:[%s511_s2 + $0x58] sm:$0xff] (!%p162_p2)  ;;  %v222_v18 = vld [vmem:[%s511_s2 + $0x40] sm:$0xff] (!%p162_p2)  ;;  %v224_v19 = vld [vmem:[%s511_s2 + $0x50] sm:$0xff] (!%p162_p2) }
   0x9   : > { %255 = vmatpush1.bf16.msra.mxu0 (!%p162_p2), %v231_v8  ;;  %v236_v17 = vpack.c.bf16 (!%p162_p2), %v225_v16, %v223_v15  ;;  %v235_v20 = vpack.c.bf16 (!%p162_p2), %v224_v19, %v222_v18  ;;  %v227_v21 = vld [vmem:[%s511_s2 + $0x68] sm:$0xff] (!%p162_p2)  ;;  %v229_v22 = vld [vmem:[%s511_s2 + $0x78] sm:$0xff] (!%p162_p2)  ;;  %v226_v24 = vld [vmem:[%s511_s2 + $0x60] sm:$0xff] (!%p162_p2)  ;;  %v243_v38 = vsub.s32 (!%p162_p2), 0, %v242_v37  ;;  %v247_v40 = vsub.s32 (!%p162_p2), 1, %v242_v37 }
   0xa   : > { %256 = vmatprep.subr.bf16.mxu0 (!%p162_p2), %v234_v11  ;;  %v238_v23 = vpack.c.bf16 (!%p162_p2), %v229_v22, %v227_v21  ;;  %v228_v25 = vld [vmem:[%s511_s2 + $0x70] sm:$0xff] (!%p162_p2)  ;;  %v378_v32 = vld [vmem:[%s510_s1] ss:$0 sm:$0xff] (!%p162_p2) }
   0xb   : > { %v237_v26 = vpack.c.bf16 (!%p162_p2), %v228_v25, %v226_v24  ;;  %v239_v39 = vld [vmem:[%s512_s3] sm:$0x3] (!%p162_p2) }
   0xc   : > { %v244_v41 = vrot.slane (!%p162_p2), %v239_v39, %v243_v38  ;;  %v248_v42 = vrot.slane (!%p162_p2), %v239_v39, %v247_v40 }
   0xd   : > { %s515_s16 = smov (!%p186_p3, %s370_s16), 1  ;;  %257 = vmatpush1.bf16.msra.mxu0 %v233_v14 }
   0xe   : > { %s375_s17 = sshll.u32 %s515_s16, 3  ;;  %258 = vmatprep.subr.bf16.mxu0 %v236_v17  ;;  %s382_s7 = sshll.u32 %s515_s16, 4 }
   0xf   : > { %s189_s20 = scalar_lea.vmem %s509_s0, %s375_s17  ;;  %s194_s10 = scalar_lea.vmem %s513_s4, %s382_s7 }
  0x10   : > { %v196_v0 = vld [vmem:[%s189_s20] sm:$0xff] }
  0x11   : > { %v198_v1 = vmul.f32 %v196_v0, %v196_v0  ;;  %259 = vmatpush1.bf16.msra.mxu0 %v235_v20 }
  0x12   : > { %260 = vmatprep.subr.bf16.mxu0 %v238_v23 }
  0x13   : > { %v200_v2 = vsel %vm199_vm0, %v198_v1, 0.0 }
  0x14   : > { %201 = vadd.xlane.f32.xlu0 %v200_v2 }
  0x15   : > { %261 = vmatpush1.bf16.msra.mxu0 %v237_v26 }
  0xa1   : > { %v202_v28 = vpop.xlane.xlu0 %201 }
  0xa2   : > { %v203_v29 = vadd.f32 1e-24, %v202_v28 }
  0xa4   : > { %392 = vrsqrt.f32 %v203_v29 }
  0xae   : > { %v393_v30 = vpop.eup %392 }
  0xaf   : > { %v205_v31 = vmul.f32 8.0, %v393_v30 }
  0xb1   : > { %v206_v33 = vmul.f32 %v205_v31, %v196_v0 }
  0xb3   : > { %v213_v34 = vmul.f32 %v378_v32, %v206_v33 }
  0xb5   : > { %v230_v35 = vpack.c.bf16 %v213_v34, %v213_v34 }
  0xb7   : > { %379 = vmatmul.mubr.msk.bf16.vlgmr.msra.gmra.mrb[0].mxu0 %vm199_vm0, %v230_v35 }
 0x18a   : > { %v288_v43 = vpop.f32.mrb[0].mxu0 }
 0x18b   : > { %v289_v44 = vadd.f32 %v288_v43, %v244_v41  ;;  %v290_v45 = vpop.f32.mrb[1].mxu0 }
 0x18c   : > { %v291_v46 = vadd.f32 %v290_v45, %v248_v42  ;;  %v292_v47 = vpop.f32.mrb[2].mxu0 }
 0x18d   : > { %v295_v48 = vmul.f32 %v289_v44, %v289_v44  ;;  %v293_v49 = vpop.f32.mrb[3].mxu0 }
 0x18e   : > { %v296_v50 = vmul.f32 %v291_v46, %v291_v46 }
 0x18f   : > { %v297_v51 = vmul.f32 %v295_v48, %v289_v44 }
 0x190   : > { %v298_v52 = vmul.f32 %v296_v50, %v291_v46 }
 0x191   : > { %v299_v53 = vmul.f32 0.044715, %v297_v51 }
 0x192   : > { %v300_v54 = vmul.f32 0.044715, %v298_v52 }
 0x193   : > { %v301_v55 = vadd.f32 %v299_v53, %v289_v44 }
 0x194   : > { %v302_v56 = vadd.f32 %v300_v54, %v291_v46 }
 0x195   : > { %v303_v57 = vmul.f32 0.7978846, %v301_v55 }
 0x196   : > { %v304_v58 = vmul.f32 0.7978846, %v302_v56 }
 0x197   : > { %394 = vtanh.f32 %v303_v57 }
 0x198   : > { %396 = vtanh.f32 %v304_v58 }
 0x1a1   : > { %v395_v59 = vpop.eup %394 }
 0x1a2   : > { %v397_v60 = vpop.eup %396  ;;  %v307_v61 = vadd.f32 1.0, %v395_v59 }
 0x1a3   : > { %v308_v62 = vadd.f32 1.0, %v397_v60 }
 0x1a4   : > { %v309_v63 = vmul.f32 0.5, %v307_v61 }
 0x1a5   : > { %v310_v0 = vmul.f32 0.5, %v308_v62 }
 0x1a6   : > { %v311_v1 = vmul.f32 %v309_v63, %v289_v44 }
 0x1a7   : > { %v312_v2 = vmul.f32 %v310_v0, %v291_v46 }
 0x1a8   : > { %313 = vst [vmem:[%s194_s10] sm:$0xff] %v311_v1 }
 0x1a9   : > { %314 = vst [vmem:[%s194_s10 + $0x8] sm:$0xff] %v312_v2 }
 0x1aa PF: > { %s14_s15 = sadd.s32 1, %s404_s15  }
 0x1ab   : > { %p11_p4 = scmp.ge.s32.totalorder %s14_s15, 4  }
 0x1ad   :  { %13 = sbr.rel (!%p11_p4) target bundleno = 1 (0x1), region = 66 }

// kernel: duration_predictor_forward.19
= control target key start
LH: loop header
LB: loop body
LE: loop exit
PB: predicated region body
PF: predicated region fallthrough
CT: control target
= control target key end

     0   :  { %s1284_s21 = smov 0   ;;  %s1286_s22 = smov 0   ;;  %s1467_s0 = inlined_call_operand.vmem [shape: f32[2,8,192], index: 0, kind: input, shape index: {}, may-alias: {0,1}]   ;;  %s1468_s1 = inlined_call_operand.vmem [shape: f32[2,8,192], index: 1, kind: input, shape index: {}, may-alias: {0,1}]   ;;  %s1469_s2 = inlined_call_operand.vmem [shape: f32[8,16], index: 2, kind: input, shape index: {}, may-alias: {2,4}]   ;;  %s1470_s3 = inlined_call_operand.vmem [shape: f32[8,16], index: 3, kind: input, shape index: {}, may-alias: {3,5}]   ;;  %s1471_s4 = inlined_call_operand.vmem [shape: f32[8,16], index: 4, kind: input, shape index: {}, may-alias: {2,4}]   ;;  %s1472_s5 = inlined_call_operand.vmem [shape: f32[8,16], index: 5, kind: input, shape index: {}, may-alias: {3,5}]   ;;  %s1473_s6 = inlined_call_operand.vmem [shape: f32[2,8,64], index: 6, kind: output, shape index: {}]  }
   0x1   :  { %s1288_s23 = smov 0  }
   0x2 LB: > { %s28_s24 = sadd.s32 1, %s1226_s22  ;;  %p1069_p0 = scmp.ge.s32.totalorder %s1230_s23, 1  ;;  %s1230_s23 = sphi %s1288_s23, %s16_s23   ;;  %s1226_s22 = sphi %s1286_s22, %s1475_s22   ;;  %s1222_s21 = sphi %s1284_s21, %s1474_s21  }
   0x3   : > { %p30_p1 = scmp.ge.s32.totalorder %s28_s24, 2  ;;  %p260_p2 = scmp.lt.s32.totalorder %s1230_s23, 3 }
   0x5   : > { %s1477_s24 = smov (%p30_p1, %s28_s24), 0  ;;  %p261_p3 = pnand %p1069_p0, %p260_p2 }
   0x6   : > { %p309_p4 = scmp.lt.s32.totalorder (!%p261_p3), %s1222_s21, 1  ;;  %v1305_v0 = vld [vmem:[%s1471_s4] sm:$0xff] (!%p261_p3)  ;;  %s1232_s27 = smov (!%p261_p3), 64   ;;  %vm354_vm0 = vcmask (!%p261_p3), 64512   ;;  %v1242_v8 = vmov (!%p261_p3), 0.0   ;;  %vm1243_vm1 = vmmov (!%p261_p3), 0  }
   0x7   : > { %264 = sbr.rel (%p261_p3) target bundleno = 1843 (0x733), region = 44  ;;  %359 = vrot.lane.b32.xlu1 (!%p261_p3), %v1305_v0, %s1232_s27  ;;  %s1233_s8 = smov (!%p261_p3), 56   ;;  %v1325_v3 = vld [vmem:[%s1472_s5] sm:$0xff] (!%p261_p3)  ;;  %1103 = vmatprep.subr.bf16.mxu0 (!%p261_p3), %v1242_v8  ;;  %vm382_vm2 = vcmask (!%p261_p3), 130048   ;;  %vm446_vm3 = vcmask (!%p261_p3), 1043456   ;;  %vm934_vm4 = vcmask (!%p261_p3), 261120  }
   0x8   : > { %s1234_s9 = smov (!%p261_p3), 72   ;;  %s1235_s15 = smov (!%p261_p3), 120   ;;  %1109 = vmatprep.subr.bf16.mxu1 (!%p261_p3), %v1242_v8  ;;  %1105 = vmatprep.mubr.msk.bf16.mxu0 (!%p261_p3), %vm1243_vm1, %v1242_v8  ;;  %v342_v19 = vld [vmem:[%s1469_s2] sm:$0xff] (!%p261_p3)  ;;  %vm936_vm5 = vcmask (!%p261_p3), 392192   ;;  %vm938_vm6 = vcmask (!%p261_p3), 523264  }
   0x9   : > { %s1236_s16 = smov (!%p261_p3), 40   ;;  %s1237_s17 = smov (!%p261_p3), 104   ;;  %1111 = vmatprep.mubr.msk.bf16.mxu1 (!%p261_p3), %vm1243_vm1, %v1242_v8  ;;  %v343_v20 = vld [vmem:[%s1470_s3] sm:$0xff] (!%p261_p3) }
   0xa   : > { %s1238_s18 = smov (!%p261_p3), 24   ;;  %s1239_s19 = smov (!%p261_p3), 88  }
   0xb   : > { %s1240_s20 = smov (!%p261_p3), 8   ;;  %s1241_s25 = smov (!%p261_p3), 80  }
   0xc   : > { %s1247_s10 = smov (!%p261_p3), 112   ;;  %s1248_s11 = smov (!%p261_p3), 48  }
   0xe   : > { %s1479_s21 = smov (!%p309_p4, %s1222_s21), 1 }
   0xf   : > { %s1085_s28 = sshll.u32 %s1479_s21, 4 }
  0x10   : > { %s1315_s7 = scalar_lea.vmem %s1468_s1, %s1085_s28  ;;  %s317_s14 = scalar_lea.vmem %s1467_s0, %s1085_s28 }
  0x11   : > { %v1318_v1 = vld [vmem:[%s1315_s7] sm:$0xff] }
  0x12   : > { %364 = vrot.lane.b32.xlu0 %v1318_v1, %s1233_s8  ;;  %v1333_v7 = vld [vmem:[%s317_s14] sm:$0xff]  ;;  %s1245_s8 = smov 96  }
  0x13   : > { %v346_v40 = vmul.f32 %v342_v19, %v1333_v7 }
  0x16   : > { %367 = vrot.lane.b32.xlu0 %v1318_v1, %s1234_s9 }
  0x79   : > { %v360_v9 = vpop.permute.xlu1 %359 }
  0x7a   : > { %v362_v10 = vmul.f32 %v360_v9, %v1318_v1 }
  0x84   : > { %v365_v2 = vpop.permute.xlu0 %364 }
  0x88   : > { %v368_v4 = vpop.permute.xlu0 %367 }
  0x89   : > { %v370_v5 = vsel %vm354_vm0, %v365_v2, %v368_v4 }
  0x8a   : > { %v371_v6 = vmul.f32 %v370_v5, %v1325_v3 }
  0x8c   : > { %373 = vrot.lane.b32.xlu1 %v371_v6, %s1232_s27 }
  0x90   : > { %348 = vrot.lane.b32.xlu1 %v1333_v7, %s1235_s15 }
  0x94   : > { %509 = vrot.lane.b32.xlu1 %v1318_v1, %s1236_s16 }
  0x98   : > { %495 = vrot.lane.b32.xlu1 %v1333_v7, %s1237_s17 }
  0x9c   : > { %653 = vrot.lane.b32.xlu1 %v1318_v1, %s1238_s18 }
  0xa0   : > { %639 = vrot.lane.b32.xlu1 %v1333_v7, %s1239_s19 }
  0xa4   : > { %796 = vrot.lane.b32.xlu1 %v1318_v1, %s1240_s20 }
  0xa8   : > { %782 = vrot.lane.b32.xlu1 %v1333_v7, %s1234_s9  ;;  %s1246_s9 = smov 32  }
  0xac   : > { %505 = vrot.lane.b32.xlu1 %v1305_v0, %s1241_s25 }
  0xfe   : > { %v374_v11 = vpop.permute.xlu1 %373 }
  0xff   : > { %v376_v12 = vadd.f32 %v374_v11, %v362_v10 }
 0x101   : > { %v378_v13 = vpack.c.bf16 %v376_v12, %v376_v12 }
 0x102   : > { %v349_v14 = vpop.permute.xlu1 %348 }
 0x103   : > { %380 = vrot.lane.b32.xlu0 %v378_v13, %s1232_s27  ;;  %s1244_s27 = smov 16  }
 0x106   : > { %v510_v15 = vpop.permute.xlu1 %509 }
 0x107   : > { %v512_v16 = vsel %vm354_vm0, %v510_v15, %v365_v2  ;;  %351 = vrot.lane.b32.xlu0 %v1333_v7, %s1240_s20 }
 0x108   : > { %v513_v17 = vmul.f32 %v512_v16, %v1325_v3 }
 0x10a   : > { %515 = vrot.lane.b32.xlu1 %v513_v17, %s1241_s25  ;;  %v496_v18 = vpop.permute.xlu1 %495 }
 0x10b   : > { %v498_v21 = vsel %vm354_vm0, %v496_v18, %v349_v14 }
 0x10c   : > { %v499_v22 = vmul.f32 %v498_v21, %v343_v20 }
 0x10e   : > { %491 = vrot.lane.b32.xlu1 %v342_v19, %s1244_s27  ;;  %v654_v23 = vpop.permute.xlu1 %653 }
 0x10f   : > { %v656_v24 = vsel %vm354_vm0, %v654_v23, %v510_v15 }
 0x110   : > { %v657_v25 = vmul.f32 %v656_v24, %v1325_v3 }
 0x112   : > { %501 = vrot.lane.b32.xlu1 %v499_v22, %s1244_s27  ;;  %v640_v26 = vpop.permute.xlu1 %639  ;;  %v341_v22 = vld [vmem:[%s1315_s7 + $0x8] sm:$0xff]  ;;  %s1074_s7 = sshll.u32 %s1479_s21, 3 }
 0x113   : > { %v642_v27 = vsel %vm354_vm0, %v640_v26, %v496_v18  ;;  %s337_s14 = scalar_lea.vmem %s1473_s6, %s1074_s7 }
 0x114   : > { %v643_v29 = vmul.f32 %v642_v27, %v343_v20 }
 0x116   : > { %659 = vrot.lane.b32.xlu1 %v657_v25, %s1245_s8  ;;  %v797_v28 = vpop.permute.xlu1 %796 }
 0x117   : > { %v799_v30 = vsel %vm354_vm0, %v797_v28, %v654_v23  ;;  %v1403_v23 = vpack.c.bf16 %v341_v22, %v341_v22 }
 0x118   : > { %v800_v31 = vmul.f32 %v799_v30, %v1325_v3 }
 0x11a   : > { %635 = vrot.lane.b32.xlu1 %v342_v19, %s1246_s9  ;;  %v783_v32 = vpop.permute.xlu1 %782 }
 0x11b   : > { %v785_v33 = vsel %vm354_vm0, %v783_v32, %v640_v26 }
 0x11c   : > { %v786_v34 = vmul.f32 %v785_v33, %v343_v20 }
 0x11e   : > { %792 = vrot.lane.b32.xlu1 %v1305_v0, %s1247_s10  ;;  %v506_v37 = vpop.permute.xlu1 %505 }
 0x11f   : > { %v508_v38 = vmul.f32 %v506_v37, %v1318_v1 }
 0x122   : > { %645 = vrot.lane.b32.xlu1 %v643_v29, %s1246_s9 }
 0x126   : > { %802 = vrot.lane.b32.xlu1 %v800_v31, %s1247_s10 }
 0x12a   : > { %788 = vrot.lane.b32.xlu1 %v786_v34, %s1248_s11 }
 0x175   : > { %v381_v35 = vpop.permute.xlu0 %380 }
 0x176   : > { %v387_v36 = vsel %vm382_vm2, %v381_v35, 0 }
 0x177   : > { %1104 = vmatpush3.bf16.xpose.msra.mxu0 %v387_v36 }
 0x178   : > { %1121 = vmatprep.subr.bf16.mxu0 %v1242_v8 }
 0x179   : > { %v352_v39 = vpop.permute.xlu0 %351 }
 0x17a   : > { %v355_v41 = vsel %vm354_vm0, %v349_v14, %v352_v39 }
 0x17b   : > { %v356_v42 = vmul.f32 %v355_v41, %v343_v20 }
 0x17c   : > { %v516_v43 = vpop.permute.xlu1 %515 }
 0x17d   : > { %v357_v44 = vadd.f32 %v356_v42, %v346_v40  ;;  %v518_v45 = vadd.f32 %v516_v43, %v508_v38 }
 0x17f   : > { %v377_v46 = vpack.c.bf16 %v357_v44, %v357_v44  ;;  %v520_v47 = vpack.c.bf16 %v518_v45, %v518_v45 }
 0x180   : > { %v492_v48 = vpop.permute.xlu1 %491 }
 0x181   : > { %525 = vrot.lane.b32.xlu1 %v520_v47, %s1248_s11  ;;  %1106 = vmatmul.mubr.msk.bf16.vlgmr.msra.gmra.mrb[0].mxu0 %vm382_vm2, %v377_v46  ;;  %v494_v49 = vmul.f32 %v492_v48, %v1333_v7 }
 0x182   : > { %1123 = vmatprep.mubr.msk.bf16.mxu0 %vm1243_vm1, %v1242_v8 }
 0x184   : > { %v502_v50 = vpop.permute.xlu1 %501 }
 0x185   : > { %v504_v51 = vadd.f32 %v502_v50, %v494_v49 }
 0x187   : > { %v519_v52 = vpack.c.bf16 %v504_v51, %v504_v51 }
 0x188   : > { %v660_v59 = vpop.permute.xlu1 %659 }
 0x189   : > { %522 = vrot.lane.b32.xlu1 %v519_v52, %s1247_s10 }
 0x18c   : > { %v636_v60 = vpop.permute.xlu1 %635 }
 0x18d   : > { %v638_v3 = vmul.f32 %v636_v60, %v1333_v7 }
 0x190   : > { %v793_v61 = vpop.permute.xlu1 %792 }
 0x191   : > { %v795_v9 = vmul.f32 %v793_v61, %v1318_v1 }
 0x194   : > { %v646_v2 = vpop.permute.xlu1 %645 }
 0x195   : > { %v648_v10 = vadd.f32 %v646_v2, %v638_v3 }
 0x197   : > { %v663_v14 = vpack.c.bf16 %v648_v10, %v648_v10 }
 0x254   : > { %v423_v53 = vpop.f32.mrb[0].mxu0 }
 0x255   : > { %v429_v54 = vmul.f32 0.25, %v423_v53  ;;  %v1107_v55 = vpop.f32.mrb[1].mxu0 }
 0x256   : > { %v426_v56 = vpop.f32.mrb[2].mxu0 }
 0x257   : > { %v1108_v57 = vpop.f32.mrb[3].mxu0  ;;  %v430_v58 = vsel %vm354_vm0, %v429_v54, -inf }
 0x258   : > { %431 = vmax.xlane.f32.xlu0 %v430_v58 }
 0x26e   : > { %649 = vrot.lane.b32.xlu0 %v1305_v0, %s1245_s8  ;;  %v803_v0 = vpop.permute.xlu1 %802 }
 0x26f   : > { %v805_v15 = vadd.f32 %v803_v0, %v795_v9 }
 0x272   : > { %778 = vrot.lane.b32.xlu0 %v342_v19, %s1248_s11  ;;  %v789_v17 = vpop.permute.xlu1 %788  ;;  %v807_v19 = vpack.c.bf16 %v805_v15, %v805_v15 }
 0x276   : > { %v526_v26 = vpop.permute.xlu1 %525 }
 0x277   : > { %v531_v30 = vsel %vm382_vm2, %v526_v26, 0 }
 0x27a   : > { %v523_v29 = vpop.permute.xlu1 %522 }
 0x2e5   : > { %v432_v62 = vpop.xlane.xlu0 %431 }
 0x2e6   : > { %v433_v63 = vsub.f32 %v429_v54, %v432_v62 }
 0x2e8   : > { %v434_v4 = vmul.f32 1.442695, %v433_v63 }
 0x2e9   : > { %v650_v5 = vpop.permute.xlu0 %649 }
 0x2ea   : > { %1192 = vpow2.f32 %v434_v4  ;;  %v652_v6 = vmul.f32 %v650_v5, %v1318_v1 }
 0x2ec   : > { %v662_v11 = vadd.f32 %v660_v59, %v652_v6 }
 0x2ed   : > { %v779_v12 = vpop.permute.xlu0 %778 }
 0x2ee   : > { %v664_v13 = vpack.c.bf16 %v662_v11, %v662_v11  ;;  %v781_v16 = vmul.f32 %v779_v12, %v1333_v7  ;;  %v448_v7 = vsel %vm446_vm3, %v1403_v23, 0 }
 0x2ef   : > { %1110 = vmatpush3.bf16.msra.mxu1 %v448_v7 }
 0x2f0   : > { %669 = vrot.lane.b32.xlu1 %v664_v13, %s1246_s9  ;;  %v791_v20 = vadd.f32 %v789_v17, %v781_v16  ;;  %1115 = vmatprep.subr.bf16.mxu1 %v1242_v8 }
 0x2f2   : > { %v806_v21 = vpack.c.bf16 %v791_v20, %v791_v20 }
 0x2f4   : > { %v1193_v18 = vpop.eup %1192  ;;  %666 = vrot.lane.b32.xlu1 %v663_v14, %s1245_s8 }
 0x2f5   : > { %v436_v1 = vsel %vm354_vm0, %v1193_v18, 0.0 }
 0x2f6   : > { %437 = vadd.xlane.f32.xlu0 %v436_v1 }
 0x2f8   : > { %812 = vrot.lane.b32.xlu1 %v807_v19, %s1244_s27 }
 0x2fc   : > { %809 = vrot.lane.b32.xlu1 %v806_v21, %s1241_s25 }
 0x362   : > { %v670_v31 = vpop.permute.xlu1 %669 }
 0x363   : > { %v675_v33 = vsel %vm382_vm2, %v670_v31, 0 }
 0x366   : > { %v667_v32 = vpop.permute.xlu1 %666 }
 0x36a   : > { %v813_v34 = vpop.permute.xlu1 %812 }
 0x36b   : > { %v818_v35 = vsel %vm382_vm2, %v813_v34, 0 }
 0x36e   : > { %v810_v36 = vpop.permute.xlu1 %809 }
 0x383   : > { %v438_v24 = vpop.xlane.xlu0 %437 }
 0x384   : > { %1194 = vrcp.f32 %v438_v24 }
 0x38e   : > { %v1195_v25 = vpop.eup %1194 }
 0x38f   : > { %v440_v27 = vmul.f32 %v1195_v25, %v1193_v18 }
 0x391   : > { %v441_v28 = vpack.c.bf16 %v440_v27, %v440_v27 }
 0x393   : > { %1112 = vmatmul.mubr.msk.bf16.vlgmr.msra.gmra.mrb[0].mxu1 %vm354_vm0, %v441_v28 }
 0x394   : > { %1116 = vmatpush3.bf16.xpose.msra.mxu1 %v531_v30  ;;  %1117 = vmatprep.mubr.msk.bf16.mxu1 %vm1243_vm1, %v1242_v8 }
 0x395   : > { %1127 = vmatprep.subr.bf16.mxu1 %v1242_v8 }
 0x39b   : > { %1118 = vmatmul.mubr.msk.bf16.vlgmr.msra.gmra.mrb[4].mxu1 %vm382_vm2, %v523_v29 }
 0x39c   : > { %1128 = vmatpush3.bf16.xpose.msra.mxu1 %v675_v33  ;;  %1129 = vmatprep.mubr.msk.bf16.mxu1 %vm1243_vm1, %v1242_v8 }
 0x39d   : > { %1139 = vmatprep.subr.bf16.mxu1 %v1242_v8 }
 0x3a3   : > { %1130 = vmatmul.mubr.msk.bf16.vlgmr.msra.gmra.mrb[8].mxu1 %vm382_vm2, %v667_v32 }
 0x3a4   : > { %1140 = vmatpush3.bf16.xpose.msra.mxu1 %v818_v35  ;;  %1141 = vmatprep.mubr.msk.bf16.mxu1 %vm1243_vm1, %v1242_v8 }
 0x3ab   : > { %1142 = vmatmul.mubr.msk.bf16.vlgmr.msra.gmra.mrb[12].mxu1 %vm382_vm2, %v810_v36 }
 0x466   : > { %v1423_v37 = vpop.f32.mrb[0].mxu1 }
 0x467   : > { %v1113_v38 = vpop.f32.mrb[1].mxu1 }
 0x468   : > { %v487_v39 = vpop.f32.mrb[2].mxu1 }
 0x469   : > { %v1114_v40 = vpop.f32.mrb[3].mxu1 }
 0x46e   : > { %v567_v41 = vpop.f32.mrb[4].mxu1 }
 0x46f   : > { %v573_v42 = vmul.f32 0.25, %v567_v41  ;;  %v1119_v43 = vpop.f32.mrb[5].mxu1 }
 0x470   : > { %v570_v44 = vpop.f32.mrb[6].mxu1 }
 0x471   : > { %v1120_v45 = vpop.f32.mrb[7].mxu1  ;;  %v574_v46 = vsel %vm354_vm0, %v573_v42, -inf }
 0x472   : > { %575 = vmax.xlane.f32.xlu1 %v574_v46 }
 0x476   : > { %v711_v47 = vpop.f32.mrb[8].mxu1 }
 0x477   : > { %v717_v48 = vmul.f32 0.25, %v711_v47  ;;  %v1131_v49 = vpop.f32.mrb[9].mxu1 }
 0x478   : > { %v714_v50 = vpop.f32.mrb[10].mxu1 }
 0x479   : > { %v1132_v51 = vpop.f32.mrb[11].mxu1  ;;  %v718_v52 = vsel %vm354_vm0, %v717_v48, -inf }
 0x47a   : > { %719 = vmax.xlane.f32.xlu0 %v718_v52 }
 0x47e   : > { %v854_v53 = vpop.f32.mrb[12].mxu1 }
 0x47f   : > { %v860_v54 = vmul.f32 0.25, %v854_v53  ;;  %v1143_v55 = vpop.f32.mrb[13].mxu1 }
 0x480   : > { %v857_v56 = vpop.f32.mrb[14].mxu1 }
 0x481   : > { %v861_v57 = vsel %vm354_vm0, %v860_v54, -inf  ;;  %v1144_v58 = vpop.f32.mrb[15].mxu1 }
 0x482   : > { %862 = vmax.xlane.f32.xlu0 %v861_v57 }
 0x483   : > { %730 = vrot.lane.b32.xlu1 %v1403_v23, %s1245_s8 }
 0x4ff   : > { %v576_v59 = vpop.xlane.xlu1 %575 }
 0x500   : > { %v577_v60 = vsub.f32 %v573_v42, %v576_v59 }
 0x502   : > { %v578_v61 = vmul.f32 1.442695, %v577_v60 }
 0x503   : > { %v731_v17 = vpop.permute.xlu1 %730 }
 0x504   : > { %1196 = vpow2.f32 %v578_v61  ;;  %v736_v20 = vsel %vm446_vm3, %v731_v17, 0 }
 0x507   : > { %v720_v2 = vpop.xlane.xlu0 %719 }
 0x508   : > { %v721_v3 = vsub.f32 %v717_v48, %v720_v2 }
 0x50a   : > { %v722_v5 = vmul.f32 1.442695, %v721_v3 }
 0x50c   : > { %1198 = vpow2.f32 %v722_v5 }
 0x50e   : > { %v1197_v62 = vpop.eup %1196 }
 0x50f   : > { %v580_v63 = vsel %vm354_vm0, %v1197_v62, 0.0  ;;  %v863_v4 = vpop.xlane.xlu0 %862 }
 0x510   : > { %581 = vadd.xlane.f32.xlu0 %v580_v63  ;;  %v864_v6 = vsub.f32 %v860_v54, %v863_v4 }
 0x512   : > { %v865_v9 = vmul.f32 1.442695, %v864_v6 }
 0x514   : > { %1200 = vpow2.f32 %v865_v9 }
 0x516   : > { %v1199_v10 = vpop.eup %1198 }
 0x517   : > { %v724_v11 = vsel %vm354_vm0, %v1199_v10, 0.0 }
 0x51e   : > { %v1201_v0 = vpop.eup %1200 }
 0x51f   : > { %v867_v12 = vsel %vm354_vm0, %v1201_v0, 0.0 }
 0x526   : > { %587 = vrot.lane.b32.xlu0 %v1403_v23, %s1247_s10 }
 0x545   : > { %725 = vadd.xlane.f32.xlu0 %v724_v11 }
 0x549   : > { %868 = vadd.xlane.f32.xlu0 %v867_v12 }
 0x55f   : > { %873 = vrot.lane.b32.xlu0 %v1403_v23, %s1241_s25 }
 0x59d   : > { %v582_v13 = vpop.xlane.xlu0 %581 }
 0x59e   : > { %1202 = vrcp.f32 %v582_v13 }
 0x5a1   : > { %v588_v14 = vpop.permute.xlu0 %587 }
 0x5a2   : > { %v593_v15 = vsel %vm446_vm3, %v588_v14, 0 }
 0x5a3   : > { %1122 = vmatpush3.bf16.msra.mxu0 %v593_v15 }
 0x5a4   : > { %1133 = vmatprep.subr.bf16.mxu0 %v1242_v8 }
 0x5a8   : > { %v1203_v16 = vpop.eup %1202 }
 0x5a9   : > { %v584_v18 = vmul.f32 %v1203_v16, %v1197_v62 }
 0x5ab   : > { %v585_v19 = vpack.c.bf16 %v584_v18, %v584_v18 }
 0x5ad   : > { %1124 = vmatmul.mubr.msk.bf16.vlgmr.msra.gmra.mrb[4].mxu0 %vm354_vm0, %v585_v19 }
 0x5ae   : > { %1134 = vmatpush3.bf16.msra.mxu0 %v736_v20  ;;  %1135 = vmatprep.mubr.msk.bf16.mxu0 %vm1243_vm1, %v1242_v8 }
 0x5af   : > { %1145 = vmatprep.subr.bf16.mxu0 %v1242_v8 }
 0x5d2   : > { %v726_v1 = vpop.xlane.xlu0 %725 }
 0x5d3   : > { %1204 = vrcp.f32 %v726_v1 }
 0x5d6   : > { %v869_v21 = vpop.xlane.xlu0 %868 }
 0x5d7   : > { %1206 = vrcp.f32 %v869_v21 }
 0x5da   : > { %v874_v23 = vpop.permute.xlu0 %873 }
 0x5db   : > { %v879_v24 = vsel %vm446_vm3, %v874_v23, 0 }
 0x5dd   : > { %v1205_v22 = vpop.eup %1204 }
 0x5de   : > { %v728_v7 = vmul.f32 %v1205_v22, %v1199_v10 }
 0x5e0   : > { %v729_v25 = vpack.c.bf16 %v728_v7, %v728_v7 }
 0x5e1   : > { %v1207_v26 = vpop.eup %1206 }
 0x5e2   : > { %1136 = vmatmul.mubr.msk.bf16.vlgmr.msra.gmra.mrb[8].mxu0 %vm354_vm0, %v729_v25  ;;  %v871_v27 = vmul.f32 %v1207_v26, %v1201_v0 }
 0x5e3   : > { %1146 = vmatpush3.bf16.msra.mxu0 %v879_v24  ;;  %1147 = vmatprep.mubr.msk.bf16.mxu0 %vm1243_vm1, %v1242_v8 }
 0x5e4   : > { %v872_v28 = vpack.c.bf16 %v871_v27, %v871_v27 }
 0x5ea   : > { %1148 = vmatmul.mubr.msk.bf16.vlgmr.msra.gmra.mrb[12].mxu0 %vm354_vm0, %v872_v28 }
 0x680   : > { %v629_v29 = vpop.f32.mrb[4].mxu0 }
 0x681   : > { %922 = vrot.lane.b32.xlu0 %v629_v29, %s1244_s27  ;;  %v1125_v30 = vpop.f32.mrb[5].mxu0 }
 0x682   : > { %v632_v31 = vpop.f32.mrb[6].mxu0 }
 0x683   : > { %v1126_v32 = vpop.f32.mrb[7].mxu0 }
 0x6b5   : > { %v772_v33 = vpop.f32.mrb[8].mxu0 }
 0x6b6   : > { %926 = vrot.lane.b32.xlu1 %v772_v33, %s1246_s9  ;;  %v1137_v34 = vpop.f32.mrb[9].mxu0 }
 0x6b7   : > { %v775_v35 = vpop.f32.mrb[10].mxu0 }
 0x6b8   : > { %v1138_v36 = vpop.f32.mrb[11].mxu0 }
 0x6bd   : > { %v915_v38 = vpop.f32.mrb[12].mxu0 }
 0x6be   : > { %930 = vrot.lane.b32.xlu0 %v915_v38, %s1248_s11  ;;  %v1149_v8 = vpop.f32.mrb[13].mxu0 }
 0x6bf   : > { %v918_v39 = vpop.f32.mrb[14].mxu0 }
 0x6c0   : > { %v1150_v40 = vpop.f32.mrb[15].mxu0 }
 0x6f3   : > { %v923_v41 = vpop.permute.xlu0 %922 }
 0x6f4   : > { %v933_v43 = vsel %vm382_vm2, %v1423_v37, %v923_v41 }
 0x728   : > { %v927_v42 = vpop.permute.xlu1 %926 }
 0x729   : > { %v935_v44 = vsel %vm934_vm4, %v933_v43, %v927_v42 }
 0x730   : > { %v931_v45 = vpop.permute.xlu0 %930 }
 0x731   : > { %v937_v46 = vsel %vm936_vm5, %v935_v44, %v931_v45 }
 0x732   : > { %939 = vst.msk [vmem:[%s337_s14] sm:$0xff] %vm938_vm6, %v937_v46 }
 0x733 PF: > { %s16_s23 = sadd.s32 1, %s1230_s23   ;;  %s1474_s21 = smov %s1226_s22 }
 0x734   : > { %p13_p5 = scmp.ge.s32.totalorder %s16_s23, 4   ;;  %s1475_s22 = smov %s1477_s24 }
 0x736   :  { %15 = sbr.rel (!%p13_p5) target bundleno = 2 (0x2), region = 83 }

// kernel: duration_predictor_forward.22
= control target key start
LH: loop header
LB: loop body
LE: loop exit
PB: predicated region body
PF: predicated region fallthrough
CT: control target
= control target key end

     0   :  { %s458_s15 = smov 0   ;;  %s585_s0 = inlined_call_operand.vmem [shape: f32[16,256], index: 0, kind: input, shape index: {}]   ;;  %s586_s1 = inlined_call_operand.vmem [shape: f32[256,64], index: 1, kind: input, shape index: {}]   ;;  %s587_s2 = inlined_call_operand.vmem [shape: f32[1,64], index: 2, kind: input, shape index: {}]   ;;  %s588_s3 = inlined_call_operand.vmem [shape: f32[16,64], index: 3, kind: input, shape index: {}]   ;;  %s589_s4 = inlined_call_operand.vmem [shape: f32[16,64], index: 4, kind: output, shape index: {}]  }
   0x1 LB: > { %s382_s16 = sadd.s32 4294967295, %s431_s15   ;;  %p386_p0 = scmp.ge.s32.totalorder %s431_s15, 1  ;;  %s431_s15 = sphi %s458_s15, %s14_s15  }
   0x2   : > { %p171_p1 = scmp.lt.s32.totalorder %s431_s15, 3 }
   0x4   : > { %p172_p2 = pnand %p386_p0, %p171_p1 }
   0x5   : > { %v232_v0 = vld [vmem:[%s586_s1 + $0x80] sm:$0xff] (!%p172_p2)  ;;  %v233_v1 = vld [vmem:[%s586_s1 + $0x88] sm:$0xff] (!%p172_p2)  ;;  %p200_p3 = scmp.lt.s32.totalorder (!%p172_p2), %s382_s16, 1  ;;  %v234_v5 = vld [vmem:[%s586_s1 + $0x90] sm:$0xff] (!%p172_p2)  ;;  %vm315_vm0 = vcmask (!%p172_p2), 523264  }
   0x6   : > { %175 = sbr.rel (%p172_p2) target bundleno = 260 (0x104), region = 36  ;;  %v216_v2 = vld [vmem:[%s586_s1] sm:$0xff] (!%p172_p2)  ;;  %v258_v3 = vpack.c.bf16 (!%p172_p2), %v233_v1, %v232_v0  ;;  %v217_v4 = vld [vmem:[%s586_s1 + $0x8] sm:$0xff] (!%p172_p2)  ;;  %v235_v6 = vld [vmem:[%s586_s1 + $0x98] sm:$0xff] (!%p172_p2) }
   0x7   : > { %v250_v7 = vpack.c.bf16 (!%p172_p2), %v217_v4, %v216_v2  ;;  %v259_v8 = vpack.c.bf16 (!%p172_p2), %v235_v6, %v234_v5  ;;  %v218_v9 = vld [vmem:[%s586_s1 + $0x10] sm:$0xff] (!%p172_p2)  ;;  %v219_v10 = vld [vmem:[%s586_s1 + $0x18] sm:$0xff] (!%p172_p2)  ;;  %v236_v11 = vld [vmem:[%s586_s1 + $0xa0] sm:$0xff] (!%p172_p2) }
   0x8   : > { %395 = vmatprep.subr.bf16.mxu0 (!%p172_p2), %v258_v3  ;;  %v237_v12 = vld [vmem:[%s586_s1 + $0xa8] sm:$0xff] (!%p172_p2)  ;;  %v251_v13 = vpack.c.bf16 (!%p172_p2), %v219_v10, %v218_v9  ;;  %v220_v15 = vld [vmem:[%s586_s1 + $0x20] sm:$0xff] (!%p172_p2)  ;;  %v238_v17 = vld [vmem:[%s586_s1 + $0xb0] sm:$0xff] (!%p172_p2) }
   0x9   : > { %396 = vmatpush3.bf16.msra.mxu0 (!%p172_p2), %v250_v7  ;;  %v260_v14 = vpack.c.bf16 (!%p172_p2), %v237_v12, %v236_v11  ;;  %v221_v16 = vld [vmem:[%s586_s1 + $0x28] sm:$0xff] (!%p172_p2)  ;;  %v239_v18 = vld [vmem:[%s586_s1 + $0xb8] sm:$0xff] (!%p172_p2)  ;;  %v222_v21 = vld [vmem:[%s586_s1 + $0x30] sm:$0xff] (!%p172_p2) }
   0xa   : > { %397 = vmatprep.subr.bf16.mxu0 (!%p172_p2), %v259_v8  ;;  %v252_v19 = vpack.c.bf16 (!%p172_p2), %v221_v16, %v220_v15  ;;  %v261_v20 = vpack.c.bf16 (!%p172_p2), %v239_v18, %v238_v17  ;;  %v223_v22 = vld [vmem:[%s586_s1 + $0x38] sm:$0xff] (!%p172_p2)  ;;  %v240_v23 = vld [vmem:[%s586_s1 + $0xc0] sm:$0xff] (!%p172_p2)  ;;  %v241_v24 = vld [vmem:[%s586_s1 + $0xc8] sm:$0xff] (!%p172_p2) }
   0xb   : > { %v253_v26 = vpack.c.bf16 (!%p172_p2), %v223_v22, %v222_v21  ;;  %v262_v28 = vpack.c.bf16 (!%p172_p2), %v241_v24, %v240_v23  ;;  %v224_v29 = vld [vmem:[%s586_s1 + $0x40] sm:$0xff] (!%p172_p2)  ;;  %v225_v30 = vld [vmem:[%s586_s1 + $0x48] sm:$0xff] (!%p172_p2)  ;;  %v242_v31 = vld [vmem:[%s586_s1 + $0xd0] sm:$0xff] (!%p172_p2) }
   0xc   : > { %v243_v32 = vld [vmem:[%s586_s1 + $0xd8] sm:$0xff] (!%p172_p2)  ;;  %v254_v33 = vpack.c.bf16 (!%p172_p2), %v225_v30, %v224_v29  ;;  %v226_v35 = vld [vmem:[%s586_s1 + $0x50] sm:$0xff] (!%p172_p2)  ;;  %v244_v37 = vld [vmem:[%s586_s1 + $0xe0] sm:$0xff] (!%p172_p2) }
   0xd   : > { %s591_s16 = smov (!%p200_p3, %s382_s16), 1  ;;  %398 = vmatpush3.bf16.msra.mxu0 %v251_v13  ;;  %v263_v34 = vpack.c.bf16 %v243_v32, %v242_v31  ;;  %v227_v36 = vld [vmem:[%s586_s1 + $0x58] sm:$0xff]  ;;  %v245_v38 = vld [vmem:[%s586_s1 + $0xe8] sm:$0xff]  ;;  %v228_v41 = vld [vmem:[%s586_s1 + $0x60] sm:$0xff] }
   0xe   : > { %s394_s17 = sshll.u32 %s591_s16, 4  ;;  %399 = vmatprep.subr.bf16.mxu0 %v260_v14  ;;  %v255_v39 = vpack.c.bf16 %v227_v36, %v226_v35  ;;  %v264_v40 = vpack.c.bf16 %v245_v38, %v244_v37  ;;  %v229_v42 = vld [vmem:[%s586_s1 + $0x68] sm:$0xff]  ;;  %v246_v43 = vld [vmem:[%s586_s1 + $0xf0] sm:$0xff]  ;;  %v247_v44 = vld [vmem:[%s586_s1 + $0xf8] sm:$0xff]  ;;  %s389_s12 = sshll.u32 %s591_s16, 3 }
   0xf   : > { %s514_s24 = scalar_lea.vmem %s585_s0, %s394_s17  ;;  %v256_v45 = vpack.c.bf16 %v229_v42, %v228_v41  ;;  %v265_v46 = vpack.c.bf16 %v247_v44, %v246_v43  ;;  %v230_v47 = vld [vmem:[%s586_s1 + $0x70] sm:$0xff]  ;;  %v231_v48 = vld [vmem:[%s586_s1 + $0x78] sm:$0xff]  ;;  %s208_s17 = scalar_lea.vmem %s588_s3, %s389_s12  ;;  %v391_v53 = vld [vmem:[%s587_s2] ss:$0 sm:$0xff] }
  0x10   : > { %v215_v25 = vld [vmem:[%s514_s24 + $0x8] sm:$0xff]  ;;  %v257_v49 = vpack.c.bf16 %v231_v48, %v230_v47  ;;  %v214_v50 = vld [vmem:[%s514_s24] sm:$0xff]  ;;  %s212_s21 = scalar_lea.vmem %s589_s4, %s389_s12 }
  0x11   : > { %400 = vmatpush3.bf16.msra.mxu0 %v252_v19  ;;  %v249_v27 = vpack.c.bf16 %v215_v25, %v215_v25  ;;  %v248_v51 = vpack.c.bf16 %v214_v50, %v214_v50  ;;  %v313_v57 = vld [vmem:[%s208_s17] sm:$0xff] }
  0x12   : > { %401 = vmatprep.subr.bf16.mxu0 %v261_v20 }
  0x13   : > { %305 = vmatprep.mubr.bf16.mxu0 %v249_v27 }
  0x15   : > { %402 = vmatpush3.bf16.msra.mxu0 %v253_v26 }
  0x16   : > { %403 = vmatprep.subr.bf16.mxu0 %v262_v28 }
  0x19   : > { %404 = vmatpush3.bf16.msra.mxu0 %v254_v33 }
  0x1a   : > { %405 = vmatprep.subr.bf16.mxu0 %v263_v34 }
  0x1d   : > { %406 = vmatpush3.bf16.msra.mxu0 %v255_v39 }
  0x1e   : > { %407 = vmatprep.subr.bf16.mxu0 %v264_v40 }
  0x21   : > { %408 = vmatpush3.bf16.msra.mxu0 %v256_v45 }
  0x22   : > { %409 = vmatprep.subr.bf16.mxu0 %v265_v46 }
  0x25   : > { %410 = vmatpush3.bf16.msra.mxu0 %v257_v49 }
  0x28   : > { %306 = vmatmul.mubr.bf16.vlgmr.msra.gmra.mrb[0].mxu0 %v248_v51 }
  0xfb   : > { %v411_v52 = vpop.f32.mrb[0].mxu0 }
  0xfc   : > { %v412_v54 = vpop.f32.mrb[1].mxu0 }
  0xfd   : > { %v413_v55 = vadd.f32 %v412_v54, %v411_v52  ;;  %v414_v56 = vpop.f32.mrb[2].mxu0 }
  0xfe   : > { %v415_v58 = vpop.f32.mrb[3].mxu0 }
  0xff   : > { %v308_v59 = vadd.f32 %v413_v55, %v391_v53 }
 0x101   : > { %v314_v60 = vadd.f32 %v313_v57, %v308_v59 }
 0x103   : > { %316 = vst.msk [vmem:[%s212_s21] sm:$0xff] %vm315_vm0, %v314_v60 }
 0x104 PF: > { %s14_s15 = sadd.s32 1, %s431_s15  }
 0x105   : > { %p11_p4 = scmp.ge.s32.totalorder %s14_s15, 4  }
 0x107   :  { %13 = sbr.rel (!%p11_p4) target bundleno = 1 (0x1), region = 69 }

// kernel: squeeze.1
= control target key start
LH: loop header
LB: loop body
LE: loop exit
PB: predicated region body
PF: predicated region fallthrough
CT: control target
= control target key end

     0   :  { %s85_s0 = inlined_call_operand.vmem [shape: f32[16], index: 0, kind: input, shape index: {}]   ;;  %s86_s1 = inlined_call_operand.hbm [shape: f32[2,8], index: 1, kind: output, shape index: {}]  }
   0x1   :  { %v5_v0 = vld [vmem:[%s85_s0] sm:$0x1] }
   0x2   :  { %2 = vsyncpa [#allocation1], 0  ;;  %6 = vst [vmem:[#allocation3] sm:$0x1] %v5_v0  ;;  %vm8_vm0 = vcmask 64512   ;;  %s58_s0 = smov 120  }
   0x3   :  { %s59_s8 = smov [#allocation0]  }
   0x4   :  { %s26_s9 = sshll.u32 %s59_s8, 4  ;;  %s27_s9 = int_to_ptr.vmem [resolvable:$true] %s26_s9 }
   0x5   :  { %s34_s10 = scalar_lea.vmem %s27_s9, 32  ;;  %p39_p1 = scmp.lt.s32.totalorder %s27_s9, %s27_s9 }
   0x6   :  { %p35_p0 = scmp.ne.s32.totalorder %s27_s9, %s34_s10  ;;  %p40_p2 = scmp.lt.s32.totalorder %s34_s10, %s34_s10 }
   0x8   :  { %p41_p3 = por %p40_p2, %p39_p1 }
   0x9   :  { %v10_v1 = vld [vmem:[#allocation3] sm:$0x1]  }
   0xa   :  { %v7_v2 = vld [vmem:[#allocation3] sm:$0x1]   ;;  %11 = vrot.lane.b32.xlu0 %v10_v1, %s58_s0  ;;  %p42_p4 = pnand %p41_p3, %p35_p0 }
   0xb   :  { %9 = vst.msk [vmem:[#allocation2] sm:$0x1] %vm8_vm0, %v7_v2  }
  0x7c   :  { %v12_v3 = vpop.permute.xlu0 %11  }
  0x7d   :  { %15 = vst.msk [vmem:[#allocation2 + $0x1] sm:$0x1] %vm8_vm0, %v12_v3  }
  0x84   :  { %v19_v4 = vld [vmem:[#allocation2] sm:$0x3] }
  0x85   :  { %21 = vst [vmem:[#allocation0] sm:$0x3] %v19_v4 }
  0x86   :  { %45 = shalt.err (!%p42_p4)
}
  0x87   :  { %s46_s13 = scalar_lea.hbm %s86_s1, 32 }
  0x88   :  { %p47_p5 = scmp.ne.s32.totalorder %s86_s1, %s46_s13  ;;  %p50_p6 = scmp.lt.u32.totalorder %s46_s13, %s86_s1 }
  0x8a   :  { %p52_p7 = pnand %p50_p6, %p47_p5 }
  0x8c   :  { %55 = shalt.err (!%p52_p7)
}
  0x8d   :  { %29 = dma.vmem_to_hbm [thread:$0]  %s27_s9, 32, %s86_s1, [#allocation1]  }
  0x8e   :  { %56 = dma.done.wait [#allocation1], 32  }
  0x8f   :  { %57 = vsyncadd [#allocation1], 4294967264 }
  0x90   :  { %31 = vsyncpa [#allocation1], 1 }

// kernel: duration_predictor_forward.23
= control target key start
LH: loop header
LB: loop body
LE: loop exit
PB: predicated region body
PF: predicated region fallthrough
CT: control target
= control target key end

     0   :  { %s374_s12 = smov 0   ;;  %s446_s0 = inlined_call_operand.vmem [shape: f32[16,128], index: 0, kind: input, shape index: {}]   ;;  %s447_s1 = inlined_call_operand.vmem [shape: f32[128,64], index: 1, kind: input, shape index: {}]   ;;  %s448_s2 = inlined_call_operand.vmem [shape: f32[1,64], index: 2, kind: input, shape index: {}]   ;;  %s449_s3 = inlined_call_operand.vmem [shape: f32[16,64], index: 3, kind: output, shape index: {}]  }
   0x1 LB: > { %s295_s13 = sadd.s32 4294967295, %s350_s12   ;;  %p299_p0 = scmp.ge.s32.totalorder %s350_s12, 1  ;;  %s350_s12 = sphi %s374_s12, %s13_s12  }
   0x2   : > { %p136_p1 = scmp.lt.s32.totalorder %s350_s12, 3 }
   0x4   : > { %p137_p2 = pnand %p299_p0, %p136_p1 }
   0x5   : > { %v168_v0 = vld [vmem:[%s447_s1] sm:$0xff] (!%p137_p2)  ;;  %v169_v1 = vld [vmem:[%s447_s1 + $0x8] sm:$0xff] (!%p137_p2)  ;;  %v170_v2 = vld [vmem:[%s447_s1 + $0x10] sm:$0xff] (!%p137_p2)  ;;  %v352_v3 = vmov (!%p137_p2), 0.0   ;;  %vm353_vm0 = vmmov (!%p137_p2), 0   ;;  %p158_p3 = scmp.lt.s32.totalorder (!%p137_p2), %s295_s13, 1 }
   0x6   : > { %140 = sbr.rel (%p137_p2) target bundleno = 254 (0xfe), region = 32  ;;  %314 = vmatprep.subr.bf16.mxu0 (!%p137_p2), %v352_v3  ;;  %v185_v4 = vpack.c.bf16 (!%p137_p2), %v169_v1, %v168_v0  ;;  %v171_v5 = vld [vmem:[%s447_s1 + $0x18] sm:$0xff] (!%p137_p2)  ;;  %330 = vmatprep.mubr.msk.bf16.mxu0 (!%p137_p2), %vm353_vm0, %v352_v3  ;;  %v172_v7 = vld [vmem:[%s447_s1 + $0x20] sm:$0xff] (!%p137_p2)  ;;  %v173_v8 = vld [vmem:[%s447_s1 + $0x28] sm:$0xff] (!%p137_p2)  ;;  %vm240_vm1 = vcmask (!%p137_p2), 523264  }
   0x7   : > { %v186_v6 = vpack.c.bf16 (!%p137_p2), %v171_v5, %v170_v2  ;;  %v187_v9 = vpack.c.bf16 (!%p137_p2), %v173_v8, %v172_v7  ;;  %v174_v10 = vld [vmem:[%s447_s1 + $0x30] sm:$0xff] (!%p137_p2)  ;;  %v175_v11 = vld [vmem:[%s447_s1 + $0x38] sm:$0xff] (!%p137_p2)  ;;  %v176_v13 = vld [vmem:[%s447_s1 + $0x40] sm:$0xff] (!%p137_p2) }
   0x8   : > { %315 = vmatpush3.bf16.msra.mxu0 (!%p137_p2), %v185_v4  ;;  %v188_v12 = vpack.c.bf16 (!%p137_p2), %v175_v11, %v174_v10  ;;  %v177_v14 = vld [vmem:[%s447_s1 + $0x48] sm:$0xff] (!%p137_p2)  ;;  %v178_v16 = vld [vmem:[%s447_s1 + $0x50] sm:$0xff] (!%p137_p2)  ;;  %v179_v17 = vld [vmem:[%s447_s1 + $0x58] sm:$0xff] (!%p137_p2) }
   0x9   : > { %316 = vmatprep.subr.bf16.mxu0 (!%p137_p2), %v352_v3  ;;  %v189_v15 = vpack.c.bf16 (!%p137_p2), %v177_v14, %v176_v13  ;;  %v190_v18 = vpack.c.bf16 (!%p137_p2), %v179_v17, %v178_v16  ;;  %v180_v19 = vld [vmem:[%s447_s1 + $0x60] sm:$0xff] (!%p137_p2)  ;;  %v181_v20 = vld [vmem:[%s447_s1 + $0x68] sm:$0xff] (!%p137_p2)  ;;  %v182_v22 = vld [vmem:[%s447_s1 + $0x70] sm:$0xff] (!%p137_p2) }
   0xa   : > { %v191_v21 = vpack.c.bf16 (!%p137_p2), %v181_v20, %v180_v19  ;;  %v183_v23 = vld [vmem:[%s447_s1 + $0x78] sm:$0xff] (!%p137_p2)  ;;  %v302_v27 = vld [vmem:[%s448_s2] ss:$0 sm:$0xff] (!%p137_p2) }
   0xb   : > { %v192_v24 = vpack.c.bf16 (!%p137_p2), %v183_v23, %v182_v22 }
   0xc   : > { %317 = vmatpush3.bf16.msra.mxu0 (!%p137_p2), %v186_v6 }
   0xd   : > { %318 = vmatprep.subr.bf16.mxu0 %v352_v3  ;;  %s451_s13 = smov (!%p158_p3, %s295_s13), 1 }
   0xe   : > { %s300_s17 = sshll.u32 %s451_s13, 3 }
   0xf   : > { %s161_s24 = scalar_lea.vmem %s446_s0, %s300_s17  ;;  %s165_s28 = scalar_lea.vmem %s449_s3, %s300_s17 }
  0x10   : > { %319 = vmatpush3.bf16.msra.mxu0 %v187_v9  ;;  %v167_v25 = vld [vmem:[%s161_s24] sm:$0xff] }
  0x11   : > { %320 = vmatprep.subr.bf16.mxu0 %v352_v3  ;;  %v184_v26 = vpack.c.bf16 %v167_v25, %v167_v25 }
  0x14   : > { %321 = vmatpush3.bf16.msra.mxu0 %v188_v12 }
  0x15   : > { %322 = vmatprep.subr.bf16.mxu0 %v352_v3 }
  0x18   : > { %323 = vmatpush3.bf16.msra.mxu0 %v189_v15 }
  0x19   : > { %324 = vmatprep.subr.bf16.mxu0 %v352_v3 }
  0x1c   : > { %325 = vmatpush3.bf16.msra.mxu0 %v190_v18 }
  0x1d   : > { %326 = vmatprep.subr.bf16.mxu0 %v352_v3 }
  0x20   : > { %327 = vmatpush3.bf16.msra.mxu0 %v191_v21 }
  0x21   : > { %328 = vmatprep.subr.bf16.mxu0 %v352_v3 }
  0x24   : > { %329 = vmatpush3.bf16.msra.mxu0 %v192_v24 }
  0x27   : > { %331 = vmatmul.mubr.bf16.vlgmr.msra.gmra.mrb[0].mxu0 %v184_v26 }
  0xfa   : > { %v234_v28 = vpop.f32.mrb[0].mxu0 }
  0xfb   : > { %v235_v29 = vadd.f32 %v302_v27, %v234_v28  ;;  %v332_v30 = vpop.f32.mrb[1].mxu0 }
  0xfc   : > { %v237_v31 = vpop.f32.mrb[2].mxu0 }
  0xfd   : > { %241 = vst.msk [vmem:[%s165_s28] sm:$0xff] %vm240_vm1, %v235_v29  ;;  %v333_v32 = vpop.f32.mrb[3].mxu0 }
  0xfe PF: > { %s13_s12 = sadd.s32 1, %s350_s12  }
  0xff   : > { %p10_p4 = scmp.ge.s32.totalorder %s13_s12, 4  }
 0x101   :  { %12 = sbr.rel (!%p10_p4) target bundleno = 1 (0x1), region = 62 }

// kernel: duration_predictor_forward.29
= control target key start
LH: loop header
LB: loop body
LE: loop exit
PB: predicated region body
PF: predicated region fallthrough
CT: control target
= control target key end

     0   :  { %s405_s15 = smov 0   ;;  %s461_s0 = inlined_call_operand.vmem [shape: f32[16,64], index: 0, kind: input, shape index: {}]   ;;  %s462_s1 = inlined_call_operand.vmem [shape: f32[1,64], index: 1, kind: input, shape index: {}]   ;;  %s463_s2 = inlined_call_operand.vmem [shape: f32[64,128], index: 2, kind: input, shape index: {}]   ;;  %s464_s3 = inlined_call_operand.vmem [shape: f32[1,128], index: 3, kind: input, shape index: {}]   ;;  %s465_s4 = inlined_call_operand.vmem [shape: f32[16,128], index: 4, kind: output, shape index: {}]  }
   0x1 LB: > { %s329_s16 = sadd.s32 4294967295, %s376_s15   ;;  %p333_p0 = scmp.ge.s32.totalorder %s376_s15, 1  ;;  %s376_s15 = sphi %s405_s15, %s14_s15  }
   0x2   : > { %p161_p1 = scmp.lt.s32.totalorder %s376_s15, 3 }
   0x4   : > { %p162_p2 = pnand %p333_p0, %p161_p1 }
   0x5   : > { %p185_p3 = scmp.lt.s32.totalorder (!%p162_p2), %s329_s16, 1  ;;  %vm197_vm0 = vcmask (!%p162_p2), 523264   ;;  %v212_v3 = vld [vmem:[%s463_s2] sm:$0xff] (!%p162_p2)  ;;  %v213_v4 = vld [vmem:[%s463_s2 + $0x8] sm:$0xff] (!%p162_p2)  ;;  %v378_v6 = vmov (!%p162_p2), 0.0   ;;  %v214_v7 = vld [vmem:[%s463_s2 + $0x10] sm:$0xff] (!%p162_p2) }
   0x6   : > { %165 = sbr.rel (%p162_p2) target bundleno = 398 (0x18e), region = 36  ;;  %v221_v5 = vpack.c.bf16 (!%p162_p2), %v213_v4, %v212_v3  ;;  %346 = vmatprep.subr.bf16.mxu0 (!%p162_p2), %v378_v6  ;;  %v215_v8 = vld [vmem:[%s463_s2 + $0x18] sm:$0xff] (!%p162_p2)  ;;  %v216_v10 = vld [vmem:[%s463_s2 + $0x20] sm:$0xff] (!%p162_p2)  ;;  %v217_v11 = vld [vmem:[%s463_s2 + $0x28] sm:$0xff] (!%p162_p2)  ;;  %vm379_vm1 = vmmov (!%p162_p2), 0  }
   0x7   : > { %v222_v9 = vpack.c.bf16 (!%p162_p2), %v215_v8, %v214_v7  ;;  %v223_v12 = vpack.c.bf16 (!%p162_p2), %v217_v11, %v216_v10  ;;  %v218_v13 = vld [vmem:[%s463_s2 + $0x30] sm:$0xff] (!%p162_p2)  ;;  %v219_v14 = vld [vmem:[%s463_s2 + $0x38] sm:$0xff] (!%p162_p2)  ;;  %354 = vmatprep.mubr.msk.bf16.mxu0 (!%p162_p2), %vm379_vm1, %v378_v6  ;;  %v336_v20 = vld [vmem:[%s462_s1] ss:$0 sm:$0xff] (!%p162_p2) }
   0x8   : > { %347 = vmatpush3.bf16.msra.mxu0 (!%p162_p2), %v221_v5  ;;  %v224_v15 = vpack.c.bf16 (!%p162_p2), %v219_v14, %v218_v13  ;;  %v337_v24 = vld [vmem:[%s464_s3] ss:$0 sm:$0xff] (!%p162_p2) }
   0x9   : > { %348 = vmatprep.subr.bf16.mxu0 (!%p162_p2), %v378_v6 }
   0xc   : > { %349 = vmatpush3.bf16.msra.mxu0 (!%p162_p2), %v222_v9 }
   0xd   : > { %s467_s16 = smov (!%p185_p3, %s329_s16), 1  ;;  %350 = vmatprep.subr.bf16.mxu0 %v378_v6 }
   0xe   : > { %s334_s17 = sshll.u32 %s467_s16, 3 }
   0xf   : > { %s188_s20 = scalar_lea.vmem %s461_s0, %s334_s17 }
  0x10   : > { %v194_v0 = vld [vmem:[%s188_s20] sm:$0xff]  ;;  %351 = vmatpush3.bf16.msra.mxu0 %v223_v12  ;;  %s192_s20 = scalar_lea.vmem %s465_s4, %s334_s17 }
  0x11   : > { %v196_v1 = vmul.f32 %v194_v0, %v194_v0  ;;  %352 = vmatprep.subr.bf16.mxu0 %v378_v6 }
  0x13   : > { %v198_v2 = vsel %vm197_vm0, %v196_v1, 0.0 }
  0x14   : > { %199 = vadd.xlane.f32.xlu0 %v198_v2  ;;  %353 = vmatpush3.bf16.msra.mxu0 %v224_v15 }
  0xa1   : > { %v200_v16 = vpop.xlane.xlu0 %199 }
  0xa2   : > { %v201_v17 = vadd.f32 1e-24, %v200_v16 }
  0xa4   : > { %368 = vrsqrt.f32 %v201_v17 }
  0xae   : > { %v369_v18 = vpop.eup %368 }
  0xaf   : > { %v203_v19 = vmul.f32 8.0, %v369_v18 }
  0xb1   : > { %v204_v21 = vmul.f32 %v203_v19, %v194_v0 }
  0xb3   : > { %v211_v22 = vmul.f32 %v336_v20, %v204_v21 }
  0xb5   : > { %v220_v23 = vpack.c.bf16 %v211_v22, %v211_v22 }
  0xb7   : > { %355 = vmatmul.mubr.msk.bf16.vlgmr.msra.gmra.mrb[0].mxu0 %vm197_vm0, %v220_v23 }
 0x18a   : > { %v269_v25 = vpop.f32.mrb[0].mxu0 }
 0x18b   : > { %v270_v26 = vadd.f32 %v337_v24, %v269_v25  ;;  %v356_v27 = vpop.f32.mrb[1].mxu0 }
 0x18c   : > { %v272_v28 = vpop.f32.mrb[2].mxu0 }
 0x18d   : > { %275 = vst [vmem:[%s192_s20] sm:$0xff] %v270_v26  ;;  %v357_v29 = vpop.f32.mrb[3].mxu0 }
 0x18e PF: > { %s14_s15 = sadd.s32 1, %s376_s15  }
 0x18f   : > { %p11_p4 = scmp.ge.s32.totalorder %s14_s15, 4  }
 0x191   :  { %13 = sbr.rel (!%p11_p4) target bundleno = 1 (0x1), region = 66 }

</bundles_post_ra>
